<compile_context>
chip_gen: v7x
topology: tpu7x:2x2x1
jax: 0.10.0
libtpu: 0.0.40
codegen_flags: <defaults>
</compile_context>

<pallas_src>
import functools

import numpy as np

import jax
import jax.numpy as jnp
from jax.experimental import pallas as pl
from jax.experimental.pallas import tpu as pltpu

# ----------------------------------------------------------------------------
# Model configuration (final branch of forward() is the padding branch).
# ----------------------------------------------------------------------------
IN_DIM = 3
LATENT_DIM = 32
WIDTH = HEIGHT = 16
ECL = [4, 8]      # encoder channels
EKL = [3, 3]      # encoder kernels
DCL = [4, 3]      # decoder channels
DKL = [3, 1]      # decoder kernels
BATCH = 2

T = 16                              # every channel lives on a 16x16 canvas band
LANES = 128                         # lane-dense width of the mega-slabs
H1 = HEIGHT - EKL[0] + 1            # 14 (valid size after conv1)
H2 = H1 - EKL[1] + 1                # 12 (valid size after conv2)
FLAT = H2 * H2 * ECL[-1]            # 1152

# ---- packed (·,128) weight-slab row offsets (all multiples of 8) ------------
OFF_WENC1 = 0                               # (384,128) conv1 K-concat weight
OFF_WENC2 = OFF_WENC1 + 3 * LANES           # (384,128) conv2
OFF_WDEC1 = OFF_WENC2 + 3 * LANES           # (384,128) convT1
OFF_WD2 = OFF_WDEC1 + 3 * LANES             # (512,128) dec_linear -> slab
OFF_HENC = OFF_WD2 + T * LATENT_DIM         # (512,128) h-block collapse
OFF_ADEC2 = OFF_HENC + T * LATENT_DIM       # (128,128) convT2 (1x1)
OFF_G = OFF_ADEC2 + LANES                   # (32,128)  band sum+broadcast
OFF_BDSLAB = OFF_G + 2 * T                  # (32,128)  dec_linear bias slab
OFF_MASK12 = OFF_BDSLAB + 2 * T             # (32,128)  valid 12x12 mask
OFF_MASK14 = OFF_MASK12 + 2 * T             # (32,128)  valid 14x14 mask
OFF_BIAS = OFF_MASK14 + 2 * T               # (8,128)   b1,b2,bt1,bt2,benc rows
W128_ROWS = OFF_BIAS + 8                    # 2440

# ---- packed (·,512) weight-slab row offsets ---------------------------------
OFF_WENCLIN = 0                             # (256,512) enc_linear (content|style)
OFF_MENC = OFF_WENCLIN + 2 * LANES          # (32,512)  diag-block mask
OFF_EREP = OFF_MENC + 2 * T                 # (128,512) latent broadcast
W512_ROWS = OFF_EREP + LANES                # 416


# ----------------------------------------------------------------------------
# Init-time weight packing (numpy, runs once; nothing here is per-step).
# ----------------------------------------------------------------------------
def _uniform(key, shape, fan_in):
    bound = 1.0 / np.sqrt(float(fan_in))
    return np.asarray(jax.random.uniform(key, shape, jnp.float32, -bound, bound))


def _col_shift(n, shift):
    """Q with (X @ Q)[:, j] == X[:, (j + shift) % n]."""
    q = np.zeros((n, n), np.float32)
    for j in range(n):
        q[(j + shift) % n, j] = 1.0
    return q


def _chan_mix(coeff):
    """(128,128) block matrix: block (ci, co) = coeff[ci, co] * I_16."""
    cin, cout = coeff.shape
    a = np.zeros((LANES, LANES), np.float32)
    eye = np.eye(T, dtype=np.float32)
    for ci in range(cin):
        for co in range(cout):
            a[ci * T:(ci + 1) * T, co * T:(co + 1) * T] = float(coeff[ci, co]) * eye
    return a


def _bias_row(b):
    r = np.zeros((LANES,), np.float32)
    for c in range(b.shape[0]):
        r[c * T:(c + 1) * T] = b[c]
    return r


def _conv_kcat(w, transposed):
    """(384,128) K-concat conv weight: vstack over ky of sum_kx shift@chan_mix.

    Pre-summing the kx terms is exact (distributivity; the shifted channel-mix
    matrices have disjoint nonzeros), and stacking the ky blocks lets the whole
    layer run as ONE matmul with K=384 against [x | roll(x,ky=1) | roll(x,ky=2)].
    """
    k = w.shape[-1]
    blocks = []
    for ky in range(k):
        a = np.zeros((LANES, LANES), np.float32)
        for kx in range(k):
            if transposed:      # transposed conv reads input at (oy-ky, ox-kx)
                a += _col_shift(LANES, -kx) @ _chan_mix(w[:, :, ky, kx])
            else:               # conv reads input at (h+ky, w+kx)
                a += _col_shift(LANES, kx) @ _chan_mix(w[:, :, ky, kx].T)
        blocks.append(a)
    return np.concatenate(blocks, axis=0)


def init_params(key):
    keys = jax.random.split(key, 12)
    k = iter(keys)

    # ---- raw parameters (same shapes / init scheme as the PyTorch module) ----
    w1 = _uniform(next(k), (ECL[0], IN_DIM, 3, 3), IN_DIM * 9)
    b1 = _uniform(next(k), (ECL[0],), IN_DIM * 9)
    w2 = _uniform(next(k), (ECL[1], ECL[0], 3, 3), ECL[0] * 9)
    b2 = _uniform(next(k), (ECL[1],), ECL[0] * 9)
    wenc = _uniform(next(k), (LATENT_DIM, 2 * FLAT), 2 * FLAT)
    benc = _uniform(next(k), (LATENT_DIM,), 2 * FLAT)
    wdec = _uniform(next(k), (FLAT, LATENT_DIM), LATENT_DIM)
    bdec = _uniform(next(k), (FLAT,), LATENT_DIM)
    wt1 = _uniform(next(k), (ECL[1], DCL[0], 3, 3), ECL[1] * 9)
    bt1 = _uniform(next(k), (DCL[0],), ECL[1] * 9)
    wt2 = _uniform(next(k), (DCL[0], DCL[1], 1, 1), DCL[0])
    bt2 = _uniform(next(k), (DCL[1],), DCL[0])

    raw = dict(w1=w1, b1=b1, w2=w2, b2=b2, wenc=wenc, benc=benc,
               wdec=wdec, bdec=bdec, wt1=wt1, bt1=bt1, wt2=wt2, bt2=bt2)

    c2 = ECL[-1]

    # ---- (·,128) slab --------------------------------------------------------
    w128 = np.zeros((W128_ROWS, LANES), np.float32)
    w128[OFF_WENC1:OFF_WENC1 + 3 * LANES] = _conv_kcat(w1, transposed=False)
    w128[OFF_WENC2:OFF_WENC2 + 3 * LANES] = _conv_kcat(w2, transposed=False)
    w128[OFF_WDEC1:OFF_WDEC1 + 3 * LANES] = _conv_kcat(wt1, transposed=True)
    w128[OFF_ADEC2:OFF_ADEC2 + LANES] = _chan_mix(wt2[:, :, 0, 0])

    # dec_linear packed directly into the decoder slab layout (NCHW .view order)
    wd2 = np.zeros((T * LATENT_DIM, LANES), np.float32)
    bd_slab = np.zeros((2 * T, LANES), np.float32)
    for c in range(c2):
        for h in range(H2):
            for w in range(H2):
                i = c * H2 * H2 + h * H2 + w
                wd2[h * LATENT_DIM:(h + 1) * LATENT_DIM, c * T + w] = wdec[i, :]
                bd_slab[h, c * T + w] = bdec[i]
                bd_slab[T + h, c * T + w] = bdec[i]
    w128[OFF_WD2:OFF_WD2 + T * LATENT_DIM] = wd2
    w128[OFF_BDSLAB:OFF_BDSLAB + 2 * T] = bd_slab

    # h_enc: collapse the per-h 32-wide blocks -> (512,128), cols 0:32 used
    w128[OFF_HENC:OFF_HENC + T * LATENT_DIM, :LATENT_DIM] = np.tile(
        np.eye(LATENT_DIM, dtype=np.float32), (T, 1))
    # G: per-band row-sum + broadcast (32,32), stored in cols 0:32
    w128[OFF_G:OFF_G + 2 * T, :2 * T] = np.kron(
        np.eye(2, dtype=np.float32), np.ones((T, T), np.float32))

    # valid-region masks
    mask12 = np.zeros((2 * T, LANES), np.float32)
    mask14 = np.zeros((2 * T, LANES), np.float32)
    for b in range(2):
        for c in range(c2):
            mask12[b * T:b * T + H2, c * T:c * T + H2] = 1.0
        for c in range(DCL[1]):
            mask14[b * T:b * T + H1, c * T:c * T + H1] = 1.0
    w128[OFF_MASK12:OFF_MASK12 + 2 * T] = mask12
    w128[OFF_MASK14:OFF_MASK14 + 2 * T] = mask14

    # bias rows
    w128[OFF_BIAS + 0] = _bias_row(b1)
    w128[OFF_BIAS + 1] = _bias_row(b2)
    w128[OFF_BIAS + 2] = _bias_row(bt1)
    w128[OFF_BIAS + 3] = _bias_row(bt2)
    w128[OFF_BIAS + 4, :LATENT_DIM] = benc

    # ---- (·,512) slab --------------------------------------------------------
    w512 = np.zeros((W512_ROWS, 4 * LANES), np.float32)
    # enc_linear, content rows then style rows (fused content/style, K=256)
    wa = np.zeros((2 * LANES, T * LATENT_DIM), np.float32)
    for c in range(c2):
        for h in range(H2):
            for w in range(H2):
                i = c * H2 * H2 + h * H2 + w
                wa[c * T + w, h * LATENT_DIM:(h + 1) * LATENT_DIM] = wenc[:, i]
                wa[LANES + c * T + w,
                   h * LATENT_DIM:(h + 1) * LATENT_DIM] = wenc[:, FLAT + i]
    w512[OFF_WENCLIN:OFF_WENCLIN + 2 * LANES] = wa
    # diagonal h-block mask
    w512[OFF_MENC:OFF_MENC + 2 * T] = np.tile(
        np.kron(np.eye(T, dtype=np.float32),
                np.ones((1, LATENT_DIM), np.float32)), (2, 1))
    # latent broadcast to every h block: (128,512), rows 0:32 used
    w512[OFF_EREP:OFF_EREP + LATENT_DIM] = np.tile(
        np.eye(LATENT_DIM, dtype=np.float32), (1, T))

    params = dict(w128=jnp.asarray(w128), w512=jnp.asarray(w512))
    return params, raw


# ----------------------------------------------------------------------------
# The single fused Pallas kernel (per 2-sample group; everything stays in VMEM)
# ----------------------------------------------------------------------------
def _paper_joint_net_kernel(x_ref, w128_ref, w512_ref, out_ref):
    mm = functools.partial(jnp.dot, preferred_element_type=jnp.float32)

    def wb(off, n):                       # static (n,128) block of the 128-lane slab
        return w128_ref[off:off + n, :]

    def wq(off, n):                       # static (n,512) block of the 512-lane slab
        return w512_ref[off:off + n, :]

    def kcat_enc(v, nrows):
        # conv reads rows h+1, h+2  ->  roll by (nrows-1), (nrows-2)
        return jnp.concatenate(
            [v,
             pltpu.roll(v, shift=nrows - 1, axis=0),
             pltpu.roll(v, shift=nrows - 2, axis=0)], axis=1)

    def kcat_dec(v):
        # transposed conv reads rows oy-1, oy-2  ->  roll by 1, 2
        return jnp.concatenate(
            [v,
             pltpu.roll(v, shift=1, axis=0),
             pltpu.roll(v, shift=2, axis=0)], axis=1)

    # ---- shared-weight encoder, content + style batched (4 bands of 16 rows) -
    x = x_ref[...]                                                   # (64, 128)
    a1 = jnp.maximum(mm(kcat_enc(x, 4 * T), wb(OFF_WENC1, 3 * LANES))
                     + wb(OFF_BIAS + 0, 1), 0.0)      # Conv2d(3->4,k3)+ReLU, 14x14
    a2 = jnp.maximum(mm(kcat_enc(a1, 4 * T), wb(OFF_WENC2, 3 * LANES))
                     + wb(OFF_BIAS + 1, 1), 0.0)      # Conv2d(4->8,k3)+ReLU, 12x12

    a2_c = a2[0:2 * T, :]                             # content rows
    a2_s = a2[2 * T:4 * T, :]                         # style rows
    a1_c = a1[0:2 * T, :]

    # ---- enc_linear: latent = W @ [flat(content); flat(style)] + b ----------
    m_enc = wq(OFF_MENC, 2 * T)                                      # (32, 512)
    t = mm(jnp.concatenate([a2_c, a2_s], axis=1),
           wq(OFF_WENCLIN, 2 * LANES)) * m_enc                       # (32, 512)
    t3 = mm(t, wb(OFF_HENC, T * LATENT_DIM))                         # (32, 128)
    g = wb(OFF_G, 2 * T)[:, :2 * T]                                  # (32, 32)
    lat = mm(g, t3) + wb(OFF_BIAS + 4, 1)             # latent replicated per row

    # ---- dec_linear, produced directly in decoder-slab layout ---------------
    u = mm(lat, wq(OFF_EREP, LANES)) * m_enc                         # (32, 512)
    dec_in = mm(u, wb(OFF_WD2, T * LATENT_DIM)) + wb(OFF_BDSLAB, 2 * T)

    # ---- skip 1 + ConvTranspose2d(8->4, k3) + ReLU ---------------------------
    z = dec_in + a2_c * wb(OFF_MASK12, 2 * T)         # zero outside valid 12x12
    d1 = jnp.maximum(mm(kcat_dec(z), wb(OFF_WDEC1, 3 * LANES))
                     + wb(OFF_BIAS + 2, 1), 0.0)                     # 14x14

    # ---- skip 2 + ConvTranspose2d(4->3, k1) + ReLU ---------------------------
    d2 = jnp.maximum(mm(d1 + a1_c, wb(OFF_ADEC2, LANES))
                     + wb(OFF_BIAS + 3, 1), 0.0)

    # ---- final zero-pad 14x14 -> 16x16 (shift valid region by +1,+1) --------
    padded = pltpu.roll(d2 * wb(OFF_MASK14, 2 * T), shift=1, axis=0)
    out_ref[...] = pltpu.roll(padded, shift=1, axis=1)


# ----------------------------------------------------------------------------
# Wrapper: pack inputs, launch one fused kernel per 2-sample group.
# ----------------------------------------------------------------------------
@jax.jit
def paper_joint_net_forward(params, style_input, content_input):
    bsz = content_input.shape[0]
    assert bsz % 2 == 0, "wrapper packs samples in groups of 2"
    ngroups = bsz // 2

    # Pack NCHW inputs into lane-dense mega-slab groups (layout plumbing only).
    c = content_input.reshape(ngroups, 2, IN_DIM, T, T)
    s = style_input.reshape(ngroups, 2, IN_DIM, T, T)
    xs = jnp.concatenate([c, s], axis=1)                             # (G,4,3,16,16)
    xs = xs.transpose(0, 1, 3, 2, 4).reshape(ngroups * 4 * T, IN_DIM * T)
    xs = jnp.pad(xs, ((0, 0), (0, LANES - IN_DIM * T)))              # (G*64, 128)

    out = pl.pallas_call(
        _paper_joint_net_kernel,
        out_shape=jax.ShapeDtypeStruct((ngroups * 2 * T, LANES), jnp.float32),
        grid=(ngroups,),
        in_specs=[
            pl.BlockSpec((4 * T, LANES), lambda i: (i, 0)),          # per-group input
            pl.BlockSpec((W128_ROWS, LANES), lambda i: (0, 0)),      # resident weights
            pl.BlockSpec((W512_ROWS, 4 * LANES), lambda i: (0, 0)),  # resident weights
        ],
        out_specs=pl.BlockSpec((2 * T, LANES), lambda i: (i, 0)),
        compiler_params=pltpu.CompilerParams(
            dimension_semantics=("parallel",)),
    )(xs, params["w128"], params["w512"])

    # Unpack the lane-dense slab back to NCHW (tiny, plain-JAX glue).
    out = out[:, :DCL[-1] * T]                                       # (G*32, 48)
    out = out.reshape(ngroups, 2, T, DCL[-1], T).transpose(0, 1, 3, 2, 4)
    return out.reshape(bsz, DCL[-1], T, T)


# ----------------------------------------------------------------------------
# Plain-numpy fp32 reference of the module's forward (for validation only).
# ----------------------------------------------------------------------------
def reference_forward(raw, style_np, content_np):
    def conv2d(x, w, b):                      # x (B,Ci,H,W), w (Co,Ci,k,k)
        bs, ci, hh, ww = x.shape
        co, _, k, _ = w.shape
        ho, wo = hh - k + 1, ww - k + 1
        out = np.zeros((bs, co, ho, wo), np.float32)
        for ky in range(k):
            for kx in range(k):
                out += np.einsum("bchw,oc->bohw",
                                 x[:, :, ky:ky + ho, kx:kx + wo], w[:, :, ky, kx])
        return out + b.reshape(1, co, 1, 1)

    def conv_transpose2d(x, w, b):            # x (B,Ci,H,W), w (Ci,Co,k,k)
        bs, ci, hh, ww = x.shape
        _, co, k, _ = w.shape
        ho, wo = hh + k - 1, ww + k - 1
        out = np.zeros((bs, co, ho, wo), np.float32)
        for ky in range(k):
            for kx in range(k):
                out[:, :, ky:ky + hh, kx:kx + ww] += np.einsum(
                    "bchw,co->bohw", x, w[:, :, ky, kx])
        return out + b.reshape(1, co, 1, 1)

    relu = lambda v: np.maximum(v, 0.0)
    c1 = relu(conv2d(content_np, raw["w1"], raw["b1"]))
    s1 = relu(conv2d(style_np, raw["w1"], raw["b1"]))
    c2 = relu(conv2d(c1, raw["w2"], raw["b2"]))
    s2 = relu(conv2d(s1, raw["w2"], raw["b2"]))
    flat = lambda v: v.reshape(v.shape[0], -1)
    latent = np.concatenate([flat(c2), flat(s2)], axis=1) @ raw["wenc"].T + raw["benc"]
    dec_in = (latent @ raw["wdec"].T + raw["bdec"]).reshape(c2.shape)
    d1 = relu(conv_transpose2d(dec_in + c2, raw["wt1"], raw["bt1"]))
    d2 = relu(conv_transpose2d(d1 + c1, raw["wt2"], raw["bt2"]))
    out = np.zeros((d2.shape[0], d2.shape[1], HEIGHT, WIDTH), np.float32)
    out[:, :, 1:1 + d2.shape[2], 1:1 + d2.shape[3]] = d2
    return out


# ----------------------------------------------------------------------------
if __name__ == "__main__":
    key = jax.random.PRNGKey(0)
    k_style, k_content, k_params = jax.random.split(key, 3)

    style_input = jax.random.normal(k_style, (BATCH, IN_DIM, HEIGHT, WIDTH), jnp.float32)
    content_input = jax.random.normal(k_content, (BATCH, IN_DIM, HEIGHT, WIDTH), jnp.float32)

    params, raw = init_params(k_params)

    out = paper_joint_net_forward(params, style_input, content_input)
    out = np.asarray(jax.block_until_ready(out))

    assert out.shape == (BATCH, DCL[-1], HEIGHT, WIDTH), out.shape
    assert np.all(np.isfinite(out))
    # Structural invariants implied by the module semantics:
    #  - every value passed through a final ReLU -> non-negative
    #  - the final _pad_upsample adds an all-zero 1-pixel border
    assert np.all(out >= 0.0)
    border = np.concatenate([
        out[:, :, 0, :].ravel(), out[:, :, -1, :].ravel(),
        out[:, :, :, 0].ravel(), out[:, :, :, -1].ravel()])
    assert np.all(border == 0.0)

    # Numeric check vs a plain-numpy fp32 reference.  Tolerance covers the
    # DEFAULT-precision (bf16-pass) MXU matmuls used in the kernel.
    ref = reference_forward(raw, np.asarray(style_input), np.asarray(content_input))
    np.testing.assert_allclose(out, ref, rtol=5e-2, atol=5e-2)

    print("KERNEL_OK")
</pallas_src>

<mosaic_0001>
module attributes {stable_mosaic.version = 11 : i64} {
  func.func @_paper_joint_net_kernel(%arg0: i32, %arg1: memref<64x128xf32, #tpu.memory_space<vmem>>, %arg2: memref<2440x128xf32, #tpu.memory_space<vmem>>, %arg3: memref<416x512xf32, #tpu.memory_space<vmem>>, %arg4: memref<32x128xf32, #tpu.memory_space<vmem>>) attributes {dimension_semantics = [#tpu.dimension_semantics<parallel>], iteration_bounds = array<i64: 1>, scalar_prefetch = 0 : i64, scratch_operands = 0 : i64, tpu.core_type = #tpu.core_type<tc>, window_params = [{transform_indices = @transform_0, window_bounds = array<i64: 64, 128>}, {pipeline_mode = #tpu.pipeline_mode<synchronous>, transform_indices = @transform_1, window_bounds = array<i64: 2440, 128>}, {pipeline_mode = #tpu.pipeline_mode<synchronous>, transform_indices = @transform_2, window_bounds = array<i64: 416, 512>}, {transform_indices = @transform_3, window_bounds = array<i64: 32, 128>}]} {
    %c0 = arith.constant 0 : index
    %c0_0 = arith.constant 0 : index
    %0 = vector.load %arg1[%c0, %c0_0] : memref<64x128xf32, #tpu.memory_space<vmem>>, vector<64x128xf32>
    %c63_i32 = arith.constant 63 : i32
    %1 = tpu.dynamic_rotate %0 by %c63_i32 dim 0 : vector<64x128xf32>, i32 -> vector<64x128xf32>
    %c62_i32 = arith.constant 62 : i32
    %2 = tpu.dynamic_rotate %0 by %c62_i32 dim 0 : vector<64x128xf32>, i32 -> vector<64x128xf32>
    %3 = tpu.concatenate %0, %1, %2 in 1 : vector<64x128xf32>, vector<64x128xf32>, vector<64x128xf32> -> vector<64x384xf32>
    %c0_1 = arith.constant 0 : index
    %c0_2 = arith.constant 0 : index
    %4 = vector.load %arg2[%c0_1, %c0_2] : memref<2440x128xf32, #tpu.memory_space<vmem>>, vector<384x128xf32>
    %cst = arith.constant dense<0.000000e+00> : vector<64x128xf32>
    %5 = tpu.matmul %3, %4, %cst {dimension_numbers = #tpu.dot_dimension_numbers<[1], [0], [0], [1], [0, 0, 1, 1], [], []>} : vector<64x384xf32>, vector<384x128xf32>, vector<64x128xf32> -> vector<64x128xf32>
    %c2432 = arith.constant 2432 : index
    %c0_3 = arith.constant 0 : index
    %6 = vector.load %arg2[%c2432, %c0_3] : memref<2440x128xf32, #tpu.memory_space<vmem>>, vector<1x128xf32>
    %7 = vector.broadcast %6 : vector<1x128xf32> to vector<64x128xf32>
    %8 = arith.addf %5, %7 : vector<64x128xf32>
    %cst_4 = arith.constant 0.000000e+00 : f32
    %9 = vector.broadcast %cst_4 : f32 to vector<64x128xf32>
    %10 = arith.maximumf %8, %9 : vector<64x128xf32>
    %c63_i32_5 = arith.constant 63 : i32
    %11 = tpu.dynamic_rotate %10 by %c63_i32_5 dim 0 : vector<64x128xf32>, i32 -> vector<64x128xf32>
    %c62_i32_6 = arith.constant 62 : i32
    %12 = tpu.dynamic_rotate %10 by %c62_i32_6 dim 0 : vector<64x128xf32>, i32 -> vector<64x128xf32>
    %13 = tpu.concatenate %10, %11, %12 in 1 : vector<64x128xf32>, vector<64x128xf32>, vector<64x128xf32> -> vector<64x384xf32>
    %c384 = arith.constant 384 : index
    %c0_7 = arith.constant 0 : index
    %14 = vector.load %arg2[%c384, %c0_7] : memref<2440x128xf32, #tpu.memory_space<vmem>>, vector<384x128xf32>
    %cst_8 = arith.constant dense<0.000000e+00> : vector<64x128xf32>
    %15 = tpu.matmul %13, %14, %cst_8 {dimension_numbers = #tpu.dot_dimension_numbers<[1], [0], [0], [1], [0, 0, 1, 1], [], []>} : vector<64x384xf32>, vector<384x128xf32>, vector<64x128xf32> -> vector<64x128xf32>
    %c2433 = arith.constant 2433 : index
    %c0_9 = arith.constant 0 : index
    %16 = vector.load %arg2[%c2433, %c0_9] : memref<2440x128xf32, #tpu.memory_space<vmem>>, vector<1x128xf32>
    %17 = vector.broadcast %16 : vector<1x128xf32> to vector<64x128xf32>
    %18 = arith.addf %15, %17 : vector<64x128xf32>
    %cst_10 = arith.constant 0.000000e+00 : f32
    %19 = vector.broadcast %cst_10 : f32 to vector<64x128xf32>
    %20 = arith.maximumf %18, %19 : vector<64x128xf32>
    %21 = vector.extract_strided_slice %20 {offsets = [0, 0], sizes = [32, 128], strides = [1, 1]} : vector<64x128xf32> to vector<32x128xf32>
    %22 = vector.extract_strided_slice %20 {offsets = [32, 0], sizes = [32, 128], strides = [1, 1]} : vector<64x128xf32> to vector<32x128xf32>
    %23 = vector.extract_strided_slice %10 {offsets = [0, 0], sizes = [32, 128], strides = [1, 1]} : vector<64x128xf32> to vector<32x128xf32>
    %c256 = arith.constant 256 : index
    %c0_11 = arith.constant 0 : index
    %24 = vector.load %arg3[%c256, %c0_11] : memref<416x512xf32, #tpu.memory_space<vmem>>, vector<32x512xf32>
    %25 = tpu.concatenate %21, %22 in 1 : vector<32x128xf32>, vector<32x128xf32> -> vector<32x256xf32>
    %c0_12 = arith.constant 0 : index
    %c0_13 = arith.constant 0 : index
    %26 = vector.load %arg3[%c0_12, %c0_13] : memref<416x512xf32, #tpu.memory_space<vmem>>, vector<256x512xf32>
    %cst_14 = arith.constant dense<0.000000e+00> : vector<32x512xf32>
    %27 = tpu.matmul %25, %26, %cst_14 {dimension_numbers = #tpu.dot_dimension_numbers<[1], [0], [0], [1], [0, 0, 1, 1], [], []>} : vector<32x256xf32>, vector<256x512xf32>, vector<32x512xf32> -> vector<32x512xf32>
    %28 = arith.mulf %27, %24 : vector<32x512xf32>
    %c1664 = arith.constant 1664 : index
    %c0_15 = arith.constant 0 : index
    %29 = vector.load %arg2[%c1664, %c0_15] : memref<2440x128xf32, #tpu.memory_space<vmem>>, vector<512x128xf32>
    %cst_16 = arith.constant dense<0.000000e+00> : vector<32x128xf32>
    %30 = tpu.matmul %28, %29, %cst_16 {dimension_numbers = #tpu.dot_dimension_numbers<[1], [0], [0], [1], [0, 0, 1, 1], [], []>} : vector<32x512xf32>, vector<512x128xf32>, vector<32x128xf32> -> vector<32x128xf32>
    %c2304 = arith.constant 2304 : index
    %c0_17 = arith.constant 0 : index
    %31 = vector.load %arg2[%c2304, %c0_17] : memref<2440x128xf32, #tpu.memory_space<vmem>>, vector<32x128xf32>
    %32 = vector.extract_strided_slice %31 {offsets = [0, 0], sizes = [32, 32], strides = [1, 1]} : vector<32x128xf32> to vector<32x32xf32>
    %cst_18 = arith.constant dense<0.000000e+00> : vector<32x128xf32>
    %33 = tpu.matmul %32, %30, %cst_18 {dimension_numbers = #tpu.dot_dimension_numbers<[1], [0], [0], [1], [0, 0, 1, 1], [], []>} : vector<32x32xf32>, vector<32x128xf32>, vector<32x128xf32> -> vector<32x128xf32>
    %c2436 = arith.constant 2436 : index
    %c0_19 = arith.constant 0 : index
    %34 = vector.load %arg2[%c2436, %c0_19] : memref<2440x128xf32, #tpu.memory_space<vmem>>, vector<1x128xf32>
    %35 = vector.broadcast %34 : vector<1x128xf32> to vector<32x128xf32>
    %36 = arith.addf %33, %35 : vector<32x128xf32>
    %c288 = arith.constant 288 : index
    %c0_20 = arith.constant 0 : index
    %37 = vector.load %arg3[%c288, %c0_20] : memref<416x512xf32, #tpu.memory_space<vmem>>, vector<128x512xf32>
    %cst_21 = arith.constant dense<0.000000e+00> : vector<32x512xf32>
    %38 = tpu.matmul %36, %37, %cst_21 {dimension_numbers = #tpu.dot_dimension_numbers<[1], [0], [0], [1], [0, 0, 1, 1], [], []>} : vector<32x128xf32>, vector<128x512xf32>, vector<32x512xf32> -> vector<32x512xf32>
    %39 = arith.mulf %38, %24 : vector<32x512xf32>
    %c1152 = arith.constant 1152 : index
    %c0_22 = arith.constant 0 : index
    %40 = vector.load %arg2[%c1152, %c0_22] : memref<2440x128xf32, #tpu.memory_space<vmem>>, vector<512x128xf32>
    %cst_23 = arith.constant dense<0.000000e+00> : vector<32x128xf32>
    %41 = tpu.matmul %39, %40, %cst_23 {dimension_numbers = #tpu.dot_dimension_numbers<[1], [0], [0], [1], [0, 0, 1, 1], [], []>} : vector<32x512xf32>, vector<512x128xf32>, vector<32x128xf32> -> vector<32x128xf32>
    %c2336 = arith.constant 2336 : index
    %c0_24 = arith.constant 0 : index
    %42 = vector.load %arg2[%c2336, %c0_24] : memref<2440x128xf32, #tpu.memory_space<vmem>>, vector<32x128xf32>
    %43 = arith.addf %41, %42 : vector<32x128xf32>
    %c2368 = arith.constant 2368 : index
    %c0_25 = arith.constant 0 : index
    %44 = vector.load %arg2[%c2368, %c0_25] : memref<2440x128xf32, #tpu.memory_space<vmem>>, vector<32x128xf32>
    %45 = arith.mulf %21, %44 : vector<32x128xf32>
    %46 = arith.addf %43, %45 : vector<32x128xf32>
    %c1_i32 = arith.constant 1 : i32
    %47 = tpu.dynamic_rotate %46 by %c1_i32 dim 0 : vector<32x128xf32>, i32 -> vector<32x128xf32>
    %c2_i32 = arith.constant 2 : i32
    %48 = tpu.dynamic_rotate %46 by %c2_i32 dim 0 : vector<32x128xf32>, i32 -> vector<32x128xf32>
    %49 = tpu.concatenate %46, %47, %48 in 1 : vector<32x128xf32>, vector<32x128xf32>, vector<32x128xf32> -> vector<32x384xf32>
    %c768 = arith.constant 768 : index
    %c0_26 = arith.constant 0 : index
    %50 = vector.load %arg2[%c768, %c0_26] : memref<2440x128xf32, #tpu.memory_space<vmem>>, vector<384x128xf32>
    %cst_27 = arith.constant dense<0.000000e+00> : vector<32x128xf32>
    %51 = tpu.matmul %49, %50, %cst_27 {dimension_numbers = #tpu.dot_dimension_numbers<[1], [0], [0], [1], [0, 0, 1, 1], [], []>} : vector<32x384xf32>, vector<384x128xf32>, vector<32x128xf32> -> vector<32x128xf32>
    %c2434 = arith.constant 2434 : index
    %c0_28 = arith.constant 0 : index
    %52 = vector.load %arg2[%c2434, %c0_28] : memref<2440x128xf32, #tpu.memory_space<vmem>>, vector<1x128xf32>
    %53 = vector.broadcast %52 : vector<1x128xf32> to vector<32x128xf32>
    %54 = arith.addf %51, %53 : vector<32x128xf32>
    %cst_29 = arith.constant 0.000000e+00 : f32
    %55 = vector.broadcast %cst_29 : f32 to vector<32x128xf32>
    %56 = arith.maximumf %54, %55 : vector<32x128xf32>
    %57 = arith.addf %56, %23 : vector<32x128xf32>
    %c2176 = arith.constant 2176 : index
    %c0_30 = arith.constant 0 : index
    %58 = vector.load %arg2[%c2176, %c0_30] : memref<2440x128xf32, #tpu.memory_space<vmem>>, vector<128x128xf32>
    %cst_31 = arith.constant dense<0.000000e+00> : vector<32x128xf32>
    %59 = tpu.matmul %57, %58, %cst_31 {dimension_numbers = #tpu.dot_dimension_numbers<[1], [0], [0], [1], [0, 0, 1, 1], [], []>} : vector<32x128xf32>, vector<128x128xf32>, vector<32x128xf32> -> vector<32x128xf32>
    %c2435 = arith.constant 2435 : index
    %c0_32 = arith.constant 0 : index
    %60 = vector.load %arg2[%c2435, %c0_32] : memref<2440x128xf32, #tpu.memory_space<vmem>>, vector<1x128xf32>
    %61 = vector.broadcast %60 : vector<1x128xf32> to vector<32x128xf32>
    %62 = arith.addf %59, %61 : vector<32x128xf32>
    %cst_33 = arith.constant 0.000000e+00 : f32
    %63 = vector.broadcast %cst_33 : f32 to vector<32x128xf32>
    %64 = arith.maximumf %62, %63 : vector<32x128xf32>
    %c2400 = arith.constant 2400 : index
    %c0_34 = arith.constant 0 : index
    %65 = vector.load %arg2[%c2400, %c0_34] : memref<2440x128xf32, #tpu.memory_space<vmem>>, vector<32x128xf32>
    %66 = arith.mulf %64, %65 : vector<32x128xf32>
    %c1_i32_35 = arith.constant 1 : i32
    %67 = tpu.dynamic_rotate %66 by %c1_i32_35 dim 0 : vector<32x128xf32>, i32 -> vector<32x128xf32>
    %c1_i32_36 = arith.constant 1 : i32
    %68 = tpu.dynamic_rotate %67 by %c1_i32_36 dim 1 : vector<32x128xf32>, i32 -> vector<32x128xf32>
    %c0_37 = arith.constant 0 : index
    %c0_38 = arith.constant 0 : index
    %69 = vector.load %arg4[%c0_37, %c0_38] : memref<32x128xf32, #tpu.memory_space<vmem>>, vector<32x128xf32>
    tpu.vector_store %arg4[%c0_37, %c0_38], %68 {strides = array<i32>} : memref<32x128xf32, #tpu.memory_space<vmem>>, vector<32x128xf32>,
    return
  }
  func.func @transform_0(%arg0: i32) -> (i32, i32) {
    %c0_i32 = arith.constant 0 : i32
    %c0_i32_0 = arith.constant 0 : i32
    return %arg0, %c0_i32 : i32, i32
  }
  func.func @transform_1(%arg0: i32) -> (i32, i32) {
    %c0_i32 = arith.constant 0 : i32
    %c0_i32_0 = arith.constant 0 : i32
    %c0_i32_1 = arith.constant 0 : i32
    return %c0_i32, %c0_i32_0 : i32, i32
  }
  func.func @transform_2(%arg0: i32) -> (i32, i32) {
    %c0_i32 = arith.constant 0 : i32
    %c0_i32_0 = arith.constant 0 : i32
    %c0_i32_1 = arith.constant 0 : i32
    return %c0_i32, %c0_i32_0 : i32, i32
  }
  func.func @transform_3(%arg0: i32) -> (i32, i32) {
    %c0_i32 = arith.constant 0 : i32
    %c0_i32_0 = arith.constant 0 : i32
    return %arg0, %c0_i32 : i32, i32
  }
}

</mosaic_0001>

<bundles_post_ra>
// kernel: paper_joint_net_forward.1
= control target key start
LH: loop header
LB: loop body
LE: loop exit
PB: predicated region body
PF: predicated region fallthrough
CT: control target
= control target key end

     0   :  { %8 = vsyncpa [#allocation3], 0  ;;  %s3880_s0 = inlined_call_operand.vmem [shape: f32[64,128], index: 0, kind: input, shape index: {}]   ;;  %s3881_s1 = inlined_call_operand.hbm [shape: f32[2440,128], index: 1, kind: input, shape index: {}]   ;;  %s3882_s2 = inlined_call_operand.hbm [shape: f32[416,512], index: 2, kind: input, shape index: {}]   ;;  %s3883_s3 = inlined_call_operand.vmem [shape: f32[32,128], index: 3, kind: output, shape index: {}]  }
   0x1   :  { %9 = vsyncpa [#allocation5], 0  ;;  %s3463_s12 = smov [#allocation2]   ;;  %s3415_s16 = scalar_lea.hbm %s3881_s1, 39040 }
   0x2   :  { %s17_s13 = sshll.u32 %s3463_s12, 4  ;;  %p3416_p0 = scmp.ne.s32.totalorder %s3881_s1, %s3415_s16  ;;  %s18_s13 = int_to_ptr.vmem [resolvable:$true] %s17_s13 }
   0x3   :  { %p3419_p1 = scmp.lt.u32.totalorder %s3415_s16, %s3881_s1 }
   0x5   :  { %p3421_p2 = pnand %p3419_p1, %p3416_p0 }
   0x7   :  { %3424 = shalt.err (!%p3421_p2)
}
   0x8   :  { %s3425_s21 = scalar_lea.vmem %s18_s13, 39040  ;;  %p3430_p4 = scmp.lt.s32.totalorder %s18_s13, %s18_s13 }
   0x9   :  { %p3426_p3 = scmp.ne.s32.totalorder %s18_s13, %s3425_s21  ;;  %p3431_p5 = scmp.lt.s32.totalorder %s3425_s21, %s3425_s21 }
   0xb   :  { %p3432_p6 = por %p3431_p5, %p3430_p4 }
   0xd   :  { %p3433_p7 = pnand %p3432_p6, %p3426_p3 }
   0xf   :  { %3436 = shalt.err (!%p3433_p7)
}
  0x10   :  { %s3464_s22 = smov 128   ;;  %s3465_s23 = smov 8  }
  0x11   :  { %23 = dma.hbm_to_vmem [thread:$0]  %s3881_s1, 39040, %s18_s13, [#allocation3], %s3464_s22, %s3464_s22, %s3465_s23  }
  0x12   :  { %s3466_s26 = smov [#allocation4]   ;;  %s3437_s30 = scalar_lea.hbm %s3882_s2, 26624 }
  0x13   :  { %s29_s27 = sshll.u32 %s3466_s26, 4  ;;  %p3438_p8 = scmp.ne.s32.totalorder %s3882_s2, %s3437_s30  ;;  %s30_s27 = int_to_ptr.vmem [resolvable:$true] %s29_s27 }
  0x14   :  { %p3441_p9 = scmp.lt.u32.totalorder %s3437_s30, %s3882_s2 }
  0x16   :  { %p3443_p10 = pnand %p3441_p9, %p3438_p8 }
  0x18   :  { %3446 = shalt.err (!%p3443_p10)
}
  0x19   :  { %s3447_s8 = scalar_lea.vmem %s30_s27, 26624  ;;  %p3452_p12 = scmp.lt.s32.totalorder %s30_s27, %s30_s27 }
  0x1a   :  { %p3448_p11 = scmp.ne.s32.totalorder %s30_s27, %s3447_s8  ;;  %p3453_p13 = scmp.lt.s32.totalorder %s3447_s8, %s3447_s8 }
  0x1c   :  { %p3454_p0 = por %p3453_p13, %p3452_p12 }
  0x1e   :  { %p3455_p1 = pnand %p3454_p0, %p3448_p11 }
  0x20   :  { %3458 = shalt.err (!%p3455_p1)
}
  0x21   :  { %s3467_s1 = smov 512   ;;  %s3468_s9 = smov 32  }
  0x22   :  { %35 = dma.hbm_to_vmem [thread:$0]  %s3882_s2, 26624, %s30_s27, [#allocation5], %s3467_s1, %s3467_s1, %s3468_s9  }
  0x23   :  { %3459 = dma.done.wait [#allocation3], 39040  }
  0x24   :  { %3460 = vsyncadd [#allocation3], 4294928256 }
  0x25   :  { %3461 = dma.done.wait [#allocation5], 26624  }
  0x26   :  { %3462 = vsyncadd [#allocation5], 4294940672  ;;  %v102_v0 = vld [vmem:[#allocation2 + $0x80] sm:$0xff]  ;;  %v103_v1 = vld [vmem:[#allocation2 + $0x88] sm:$0xff]  ;;  %v58_v28 = vlaneseq  ;;  %vm1241_vm2 = vcmask 261120  }
  0x27   :  { %v86_v2 = vld [vmem:[#allocation2] sm:$0xff]  ;;  %v2855_v3 = vpack.c.bf16 %v103_v1, %v102_v0  ;;  %v87_v4 = vld [vmem:[#allocation2 + $0x8] sm:$0xff]  ;;  %v104_v5 = vld [vmem:[#allocation2 + $0x90] sm:$0xff] }
  0x28   :  { %v105_v6 = vld [vmem:[#allocation2 + $0x98] sm:$0xff]  ;;  %v2857_v7 = vpack.c.bf16 %v87_v4, %v86_v2  ;;  %v118_v9 = vld [vmem:[#allocation2 + $0x100] sm:$0xff]  ;;  %v119_v10 = vld [vmem:[#allocation2 + $0x108] sm:$0xff]  ;;  %v3515_v38 = vshrl.u32 %v58_v28, 7 }
  0x29   :  { %v2859_v8 = vpack.c.bf16 %v105_v6, %v104_v5  ;;  %v88_v11 = vld [vmem:[#allocation2 + $0x10] sm:$0xff]  ;;  %2856 = vmatprep.subr.bf16.mxu0 %v2855_v3  ;;  %v2887_v12 = vpack.c.bf16 %v119_v10, %v118_v9  ;;  %v89_v13 = vld [vmem:[#allocation2 + $0x18] sm:$0xff]  ;;  %v106_v14 = vld [vmem:[#allocation2 + $0xa0] sm:$0xff] }
  0x2a   :  { %v107_v15 = vld [vmem:[#allocation2 + $0xa8] sm:$0xff]  ;;  %2858 = vmatpush3.bf16.msra.mxu0 %v2857_v7  ;;  %v2861_v16 = vpack.c.bf16 %v89_v13, %v88_v11  ;;  %v120_v17 = vld [vmem:[#allocation2 + $0x110] sm:$0xff]  ;;  %v121_v18 = vld [vmem:[#allocation2 + $0x118] sm:$0xff]  ;;  %vm60_vm0 = vcmp.lt.s32.totalorder %v3515_v38, 7  ;;  %vm77_vm1 = vcmp.lt.s32.totalorder %v3515_v38, 6  ;;  %vm1851_vm3 = vcmp.lt.s32.totalorder %v3515_v38, 1 }
  0x2b   :  { %2860 = vmatprep.subr.bf16.mxu0 %v2859_v8  ;;  %2888 = vmatprep.subr.bf16.mxu1 %v2887_v12  ;;  %v2863_v19 = vpack.c.bf16 %v107_v15, %v106_v14  ;;  %v2891_v20 = vpack.c.bf16 %v121_v18, %v120_v17  ;;  %v90_v21 = vld [vmem:[#allocation2 + $0x20] sm:$0xff]  ;;  %v91_v22 = vld [vmem:[#allocation2 + $0x28] sm:$0xff]  ;;  %v108_v23 = vld [vmem:[#allocation2 + $0xb0] sm:$0xff]  ;;  %vm1860_vm4 = vcmp.lt.s32.totalorder %v3515_v38, 2 }
  0x2c   :  { %2890 = vmatpush3.bf16.msra.mxu1 %v2887_v12  ;;  %v109_v24 = vld [vmem:[#allocation2 + $0xb8] sm:$0xff]  ;;  %v122_v25 = vld [vmem:[#allocation2 + $0x120] sm:$0xff]  ;;  %v123_v26 = vld [vmem:[#allocation2 + $0x128] sm:$0xff]  ;;  %v2865_v29 = vpack.c.bf16 %v91_v22, %v90_v21 }
  0x2d   :  { %2892 = vmatprep.subr.bf16.mxu1 %v2891_v20  ;;  %v2895_v27 = vpack.c.bf16 %v123_v26, %v122_v25  ;;  %v124_v30 = vld [vmem:[#allocation2 + $0x130] sm:$0xff]  ;;  %v125_v31 = vld [vmem:[#allocation2 + $0x138] sm:$0xff]  ;;  %v2867_v32 = vpack.c.bf16 %v109_v24, %v108_v23  ;;  %v110_v35 = vld [vmem:[#allocation2 + $0xc0] sm:$0xff] }
  0x2e   :  { %2862 = vmatpush3.bf16.msra.mxu0 %v2861_v16  ;;  %v92_v33 = vld [vmem:[#allocation2 + $0x30] sm:$0xff]  ;;  %v93_v34 = vld [vmem:[#allocation2 + $0x38] sm:$0xff]  ;;  %v111_v36 = vld [vmem:[#allocation2 + $0xc8] sm:$0xff]  ;;  %v2899_v37 = vpack.c.bf16 %v125_v31, %v124_v30 }
  0x2f   :  { %2864 = vmatprep.subr.bf16.mxu0 %v2863_v19  ;;  %v2869_v39 = vpack.c.bf16 %v93_v34, %v92_v33  ;;  %v126_v40 = vld [vmem:[#allocation2 + $0x140] sm:$0xff]  ;;  %v127_v41 = vld [vmem:[#allocation2 + $0x148] sm:$0xff]  ;;  %v2871_v42 = vpack.c.bf16 %v111_v36, %v110_v35  ;;  %v112_v45 = vld [vmem:[#allocation2 + $0xd0] sm:$0xff] }
  0x30   :  { %2894 = vmatpush3.bf16.msra.mxu1 %v2891_v20  ;;  %v94_v43 = vld [vmem:[#allocation2 + $0x40] sm:$0xff]  ;;  %v95_v44 = vld [vmem:[#allocation2 + $0x48] sm:$0xff]  ;;  %v113_v46 = vld [vmem:[#allocation2 + $0xd8] sm:$0xff]  ;;  %v2903_v47 = vpack.c.bf16 %v127_v41, %v126_v40 }
  0x31   :  { %2896 = vmatprep.subr.bf16.mxu1 %v2895_v27  ;;  %v3520_v48 = vld [vmem:[%s3880_s0] sm:$0xff]  ;;  %v3525_v49 = vld [vmem:[%s3880_s0 + $0x8] sm:$0xff]  ;;  %v2873_v50 = vpack.c.bf16 %v95_v44, %v94_v43  ;;  %v128_v51 = vld [vmem:[#allocation2 + $0x150] sm:$0xff]  ;;  %v2875_v56 = vpack.c.bf16 %v113_v46, %v112_v45 }
  0x32   :  { %2866 = vmatpush3.bf16.msra.mxu0 %v2865_v29  ;;  %v129_v52 = vld [vmem:[#allocation2 + $0x158] sm:$0xff]  ;;  %v50_v53 = vrot.slane %v3520_v48, 1  ;;  %v51_v54 = vrot.slane %v3525_v49, 1  ;;  %v69_v55 = vrot.slane %v3520_v48, 2  ;;  %v96_v57 = vld [vmem:[#allocation2 + $0x50] sm:$0xff]  ;;  %v70_v59 = vrot.slane %v3525_v49, 2 }
  0x33   :  { %2868 = vmatprep.subr.bf16.mxu0 %v2867_v32  ;;  %v97_v58 = vld [vmem:[#allocation2 + $0x58] sm:$0xff]  ;;  %v114_v60 = vld [vmem:[#allocation2 + $0xe0] sm:$0xff]  ;;  %v115_v61 = vld [vmem:[#allocation2 + $0xe8] sm:$0xff]  ;;  %v2907_v63 = vpack.c.bf16 %v129_v52, %v128_v51 }
  0x34   :  { %2898 = vmatpush3.bf16.msra.mxu1 %v2895_v27  ;;  %v67_v62 = vsel %vm60_vm0, %v50_v53, %v51_v54  ;;  %v84_v0 = vsel %vm77_vm1, %v69_v55, %v70_v59  ;;  %v2877_v1 = vpack.c.bf16 %v97_v58, %v96_v57  ;;  %v130_v2 = vld [vmem:[#allocation2 + $0x160] sm:$0xff]  ;;  %v131_v3 = vld [vmem:[#allocation2 + $0x168] sm:$0xff]  ;;  %v2879_v4 = vpack.c.bf16 %v115_v61, %v114_v60  ;;  %v116_v7 = vld [vmem:[#allocation2 + $0xf0] sm:$0xff] }
  0x35   :  { %2900 = vmatprep.subr.bf16.mxu1 %v2899_v37  ;;  %203 = vmatprep.mubr.f32.mxu0 %v67_v62  ;;  %v98_v5 = vld [vmem:[#allocation2 + $0x60] sm:$0xff]  ;;  %v99_v6 = vld [vmem:[#allocation2 + $0x68] sm:$0xff]  ;;  %v117_v8 = vld [vmem:[#allocation2 + $0xf8] sm:$0xff]  ;;  %v2911_v9 = vpack.c.bf16 %v131_v3, %v130_v2 }
  0x36   :  { %2870 = vmatpush3.bf16.msra.mxu0 %v2869_v39  ;;  %2709 = vmatprep.mubr.f32.mxu1 %v84_v0  ;;  %v2881_v10 = vpack.c.bf16 %v99_v6, %v98_v5  ;;  %v132_v11 = vld [vmem:[#allocation2 + $0x170] sm:$0xff]  ;;  %v133_v12 = vld [vmem:[#allocation2 + $0x178] sm:$0xff]  ;;  %v2883_v13 = vpack.c.bf16 %v117_v8, %v116_v7  ;;  %v405_v17 = vld [vmem:[#allocation2 + $0x200] sm:$0xff] }
  0x37   :  { %2872 = vmatprep.subr.bf16.mxu0 %v2871_v42  ;;  %v100_v14 = vld [vmem:[#allocation2 + $0x70] sm:$0xff]  ;;  %v101_v15 = vld [vmem:[#allocation2 + $0x78] sm:$0xff]  ;;  %v406_v18 = vld [vmem:[#allocation2 + $0x208] sm:$0xff]  ;;  %v2915_v19 = vpack.c.bf16 %v133_v12, %v132_v11 }
  0x38   :  { %2902 = vmatpush3.bf16.msra.mxu1 %v2899_v37  ;;  %v3548_v16 = vld [vmem:[%s3880_s0 + $0x10] sm:$0xff]  ;;  %v2885_v20 = vpack.c.bf16 %v101_v15, %v100_v14  ;;  %v421_v21 = vld [vmem:[#allocation2 + $0x280] sm:$0xff]  ;;  %v422_v22 = vld [vmem:[#allocation2 + $0x288] sm:$0xff]  ;;  %v2919_v24 = vpack.c.bf16 %v406_v18, %v405_v17 }
  0x39   :  { %2904 = vmatprep.subr.bf16.mxu1 %v2903_v47  ;;  %v52_v23 = vrot.slane %v3548_v16, 1  ;;  %v389_v25 = vld [vmem:[#allocation2 + $0x180] sm:$0xff]  ;;  %v390_v26 = vld [vmem:[#allocation2 + $0x188] sm:$0xff]  ;;  %v71_v27 = vrot.slane %v3548_v16, 2  ;;  %v3555_v28 = vld [vmem:[%s3880_s0 + $0x18] sm:$0xff]  ;;  %v2951_v33 = vpack.c.bf16 %v422_v22, %v421_v21 }
  0x3a   :  { %2874 = vmatpush3.bf16.msra.mxu0 %v2873_v50  ;;  %v407_v29 = vld [vmem:[#allocation2 + $0x210] sm:$0xff]  ;;  %v408_v30 = vld [vmem:[#allocation2 + $0x218] sm:$0xff]  ;;  %v72_v31 = vrot.slane %v3555_v28, 2  ;;  %v3561_v32 = vld [vmem:[%s3880_s0 + $0x20] sm:$0xff]  ;;  %v2921_v34 = vpack.c.bf16 %v390_v26, %v389_v25  ;;  %v53_v39 = vrot.slane %v3555_v28, 1 }
  0x3b   :  { %2876 = vmatprep.subr.bf16.mxu0 %v2875_v56  ;;  %v423_v35 = vld [vmem:[#allocation2 + $0x290] sm:$0xff]  ;;  %v424_v36 = vld [vmem:[#allocation2 + $0x298] sm:$0xff]  ;;  %v66_v37 = vsel %vm60_vm0, %v51_v54, %v52_v23  ;;  %v2923_v40 = vpack.c.bf16 %v408_v30, %v407_v29  ;;  %v83_v43 = vsel %vm77_vm1, %v70_v59, %v71_v27  ;;  %v73_v44 = vrot.slane %v3561_v32, 2  ;;  %v3576_v45 = vld [vmem:[%s3880_s0 + $0x28] sm:$0xff] }
  0x3c   :  { %2906 = vmatpush3.bf16.msra.mxu1 %v2903_v47  ;;  %v391_v41 = vld [vmem:[#allocation2 + $0x190] sm:$0xff]  ;;  %v392_v42 = vld [vmem:[#allocation2 + $0x198] sm:$0xff]  ;;  %v409_v46 = vld [vmem:[#allocation2 + $0x220] sm:$0xff]  ;;  %v82_v50 = vsel %vm77_vm1, %v71_v27, %v72_v31  ;;  %v74_v51 = vrot.slane %v3576_v45, 2  ;;  %v2955_v54 = vpack.c.bf16 %v424_v36, %v423_v35  ;;  %v65_v59 = vsel %vm60_vm0, %v52_v23, %v53_v39 }
  0x3d   :  { %2908 = vmatprep.subr.bf16.mxu1 %v2907_v63  ;;  %v410_v47 = vld [vmem:[#allocation2 + $0x228] sm:$0xff]  ;;  %v3585_v52 = vld [vmem:[%s3880_s0 + $0x30] sm:$0xff]  ;;  %v2925_v56 = vpack.c.bf16 %v392_v42, %v391_v41  ;;  %v425_v57 = vld [vmem:[#allocation2 + $0x2a0] sm:$0xff]  ;;  %v54_v60 = vrot.slane %v3561_v32, 1  ;;  %v81_v0 = vsel %vm77_vm1, %v72_v31, %v73_v44 }
  0x3e   :  { %2878 = vmatpush3.bf16.msra.mxu0 %v2877_v1  ;;  %v426_v58 = vld [vmem:[#allocation2 + $0x2a8] sm:$0xff]  ;;  %v2927_v61 = vpack.c.bf16 %v410_v47, %v409_v46  ;;  %v393_v62 = vld [vmem:[#allocation2 + $0x1a0] sm:$0xff]  ;;  %v75_v1 = vrot.slane %v3585_v52, 2  ;;  %v49_v2 = vld [vmem:[%s3880_s0 + $0x38] sm:$0xff]  ;;  %v80_v5 = vsel %vm77_vm1, %v73_v44, %v74_v51  ;;  %v56_v18 = vrot.slane %v3585_v52, 1  ;;  %s3470_s0 = smov 1  }
  0x3f   :  { %2880 = vmatprep.subr.bf16.mxu0 %v2879_v4  ;;  %v411_v3 = vld [vmem:[#allocation2 + $0x230] sm:$0xff]  ;;  %v412_v4 = vld [vmem:[#allocation2 + $0x238] sm:$0xff]  ;;  %v76_v6 = vrot.slane %v49_v2, 2  ;;  %v2959_v7 = vpack.c.bf16 %v426_v58, %v425_v57  ;;  %v413_v25 = vld [vmem:[#allocation2 + $0x240] sm:$0xff] }
  0x40   :  { %2910 = vmatpush3.bf16.msra.mxu1 %v2907_v63  ;;  %v394_v63 = vld [vmem:[#allocation2 + $0x1a8] sm:$0xff]  ;;  %v2931_v11 = vpack.c.bf16 %v412_v4, %v411_v3  ;;  %v395_v12 = vld [vmem:[#allocation2 + $0x1b0] sm:$0xff]  ;;  %v428_v23 = vld [vmem:[#allocation2 + $0x2b8] sm:$0xff] }
  0x41   :  { %2912 = vmatprep.subr.bf16.mxu1 %v2911_v9  ;;  %v2929_v8 = vpack.c.bf16 %v394_v63, %v393_v62  ;;  %v78_v14 = vsel %vm77_vm1, %v75_v1, %v76_v6  ;;  %v427_v22 = vld [vmem:[#allocation2 + $0x2b0] sm:$0xff]  ;;  %v414_v26 = vld [vmem:[#allocation2 + $0x248] sm:$0xff]  ;;  %v400_v36 = vld [vmem:[#allocation2 + $0x1d8] sm:$0xff] }
  0x42   :  { %2882 = vmatpush3.bf16.msra.mxu0 %v2881_v10  ;;  %v55_v10 = vrot.slane %v3576_v45, 1  ;;  %v2935_v27 = vpack.c.bf16 %v414_v26, %v413_v25  ;;  %v398_v29 = vld [vmem:[#allocation2 + $0x1c8] sm:$0xff]  ;;  %v399_v35 = vld [vmem:[#allocation2 + $0x1d0] sm:$0xff]  ;;  %v417_v42 = vld [vmem:[#allocation2 + $0x260] sm:$0xff] }
  0x43   :  { %2884 = vmatprep.subr.bf16.mxu0 %v2883_v13  ;;  %v396_v13 = vld [vmem:[#allocation2 + $0x1b8] sm:$0xff]  ;;  %v430_v31 = vld [vmem:[#allocation2 + $0x2c8] sm:$0xff]  ;;  %v403_v58 = vld [vmem:[#allocation2 + $0x1f0] sm:$0xff] }
  0x44   :  { %2914 = vmatpush3.bf16.msra.mxu1 %v2911_v9  ;;  %v64_v9 = vsel %vm60_vm0, %v53_v39, %v54_v60  ;;  %v2933_v15 = vpack.c.bf16 %v396_v13, %v395_v12  ;;  %v63_v17 = vsel %vm60_vm0, %v54_v60, %v55_v10  ;;  %v431_v39 = vld [vmem:[#allocation2 + $0x2d0] sm:$0xff]  ;;  %v402_v46 = vld [vmem:[#allocation2 + $0x1e8] sm:$0xff]  ;;  %v436_v62 = vld [vmem:[#allocation2 + $0x2f8] sm:$0xff] }
  0x45   :  { %2916 = vmatprep.subr.bf16.mxu1 %v2915_v19  ;;  %v683_v4 = vld [vmem:[#allocation4 + $0x38] sm:$0xff]  ;;  %v676_v25 = vld [vmem:[#allocation4] sm:$0xff] }
  0x46   :  { %2886 = vmatpush3.bf16.msra.mxu0 %v2885_v20  ;;  %v57_v20 = vrot.slane %v49_v2, 1 }
  0x47   :  { %2920 = vmatprep.subr.bf16.mxu0 %v2919_v24  ;;  %v2963_v24 = vpack.c.bf16 %v428_v23, %v427_v22 }
  0x48   :  { %2918 = vmatpush3.bf16.msra.mxu1 %v2915_v19  ;;  %v62_v19 = vsel %vm60_vm0, %v55_v10, %v56_v18  ;;  %v61_v21 = vsel %vm60_vm0, %v56_v18, %v57_v20 }
  0x49   :  { %204 = vmatmul.mubr.f32.vlgmr.msra.gmra.mrb[0].mxu0 %v3520_v48  ;;  %2952 = vmatprep.subr.bf16.mxu1 %v2951_v33  ;;  %v429_v48 = vld [vmem:[#allocation2 + $0x2c0] sm:$0xff] }
  0x4a   :  { %208 = vmatprep.mubr.f32.mxu0 %v66_v37  ;;  %2922 = vmatpush3.bf16.msra.mxu0 %v2921_v34  ;;  %v2941_v37 = vpack.c.bf16 %v400_v36, %v399_v35 }
  0x4b   :  { %2710 = vmatmul.mubr.f32.vlgmr.msra.gmra.mrb[0].mxu1 %v83_v43  ;;  %2924 = vmatprep.subr.bf16.mxu0 %v2923_v40  ;;  %v432_v40 = vld [vmem:[#allocation2 + $0x2d8] sm:$0xff]  ;;  %v418_v43 = vld [vmem:[#allocation2 + $0x268] sm:$0xff] }
  0x4c   :  { %2712 = vmatprep.mubr.f32.mxu1 %v82_v50  ;;  %2954 = vmatpush3.bf16.msra.mxu1 %v2951_v33  ;;  %v416_v33 = vld [vmem:[#allocation2 + $0x258] sm:$0xff]  ;;  %v2971_v41 = vpack.c.bf16 %v432_v40, %v431_v39  ;;  %v2943_v44 = vpack.c.bf16 %v418_v43, %v417_v42  ;;  %v433_v50 = vld [vmem:[#allocation2 + $0x2e0] sm:$0xff] }
  0x4d   :  { %209 = vmatmul.mubr.f32.gmra.mrb[2].mxu0 %v3525_v49  ;;  %2956 = vmatprep.subr.bf16.mxu1 %v2955_v54  ;;  %v79_v49 = vsel %vm77_vm1, %v74_v51, %v75_v1  ;;  %v434_v51 = vld [vmem:[#allocation2 + $0x2e8] sm:$0xff]  ;;  %v681_v1 = vld [vmem:[#allocation4 + $0x28] sm:$0xff]  ;;  %v678_v39 = vld [vmem:[#allocation4 + $0x10] sm:$0xff] }
  0x4e   :  { %213 = vmatprep.mubr.f32.mxu0 %v65_v59  ;;  %2926 = vmatpush3.bf16.msra.mxu0 %v2925_v56  ;;  %v420_v56 = vld [vmem:[#allocation2 + $0x278] sm:$0xff] }
  0x4f   :  { %2713 = vmatmul.mubr.f32.gmra.mrb[2].mxu1 %v81_v0  ;;  %2928 = vmatprep.subr.bf16.mxu0 %v2927_v61  ;;  %v404_v59 = vld [vmem:[#allocation2 + $0x1f8] sm:$0xff]  ;;  %v435_v61 = vld [vmem:[#allocation2 + $0x2f0] sm:$0xff] }
  0x50   :  { %2715 = vmatprep.mubr.f32.mxu1 %v80_v5  ;;  %2958 = vmatpush3.bf16.msra.mxu1 %v2955_v54  ;;  %v419_v54 = vld [vmem:[#allocation2 + $0x270] sm:$0xff]  ;;  %v2949_v60 = vpack.c.bf16 %v404_v59, %v403_v58  ;;  %v2979_v63 = vpack.c.bf16 %v436_v62, %v435_v61  ;;  %v682_v40 = vld [vmem:[#allocation4 + $0x30] sm:$0xff] }
  0x51   :  { %214 = vmatmul.mubr.f32.gmra.mrb[4].mxu0 %v3548_v16  ;;  %2960 = vmatprep.subr.bf16.mxu1 %v2959_v7  ;;  %v85_v16 = vsel %vm77_vm1, %v76_v6, %v69_v55  ;;  %v68_v55 = vsel %vm60_vm0, %v57_v20, %v50_v53  ;;  %v2967_v53 = vpack.c.bf16 %v430_v31, %v429_v48  ;;  %v677_v0 = vld [vmem:[#allocation4 + $0x8] sm:$0xff] }
  0x52   :  { %218 = vmatprep.mubr.f32.mxu0 %v64_v9  ;;  %2930 = vmatpush3.bf16.msra.mxu0 %v2929_v8  ;;  %v2947_v57 = vpack.c.bf16 %v420_v56, %v419_v54  ;;  %v2983_v3 = vpack.c.bf16 %v681_v1, %v677_v0  ;;  %v3626_v8 = vld [vmem:[#allocation2 + $0x980] ss:$0 sm:$0xff]  ;;  %v689_v48 = vld [vmem:[#allocation4 + $0x68] sm:$0xff]  ;;  %v688_v56 = vld [vmem:[#allocation4 + $0x60] sm:$0xff] }
  0x53   :  { %2716 = vmatmul.mubr.f32.gmra.mrb[4].mxu1 %v79_v49  ;;  %2932 = vmatprep.subr.bf16.mxu0 %v2931_v11  ;;  %v697_v58 = vld [vmem:[#allocation4 + $0xa8] sm:$0xff]  ;;  %v686_v1 = vld [vmem:[#allocation4 + $0x50] sm:$0xff] }
  0x54   :  { %2718 = vmatprep.mubr.f32.mxu1 %v78_v14  ;;  %2962 = vmatpush3.bf16.msra.mxu1 %v2959_v7 }
  0x55   :  { %219 = vmatmul.mubr.f32.gmra.mrb[6].mxu0 %v3555_v28  ;;  %v397_v28 = vld [vmem:[#allocation2 + $0x1c0] sm:$0xff]  ;;  %2964 = vmatprep.subr.bf16.mxu1 %v2963_v24 }
  0x56   :  { %223 = vmatprep.mubr.f32.mxu0 %v63_v17  ;;  %2934 = vmatpush3.bf16.msra.mxu0 %v2933_v15  ;;  %v2937_v30 = vpack.c.bf16 %v398_v29, %v397_v28  ;;  %v680_v29 = vld [vmem:[#allocation4 + $0x20] sm:$0xff] }
  0x57   :  { %2719 = vmatmul.mubr.f32.gmra.mrb[6].mxu1 %v85_v16  ;;  %2936 = vmatprep.subr.bf16.mxu0 %v2935_v27  ;;  %v2985_v42 = vpack.c.bf16 %v680_v29, %v676_v25  ;;  %v694_v25 = vld [vmem:[#allocation4 + $0x90] sm:$0xff] }
  0x58   :  { %2966 = vmatpush3.bf16.msra.mxu1 %v2963_v24 }
  0x59   :  { %224 = vmatmul.mubr.f32.gmra.mrb[8].mxu0 %v3561_v32  ;;  %v415_v32 = vld [vmem:[#allocation2 + $0x250] sm:$0xff]  ;;  %2968 = vmatprep.subr.bf16.mxu1 %v2967_v53 }
  0x5a   :  { %228 = vmatprep.mubr.f32.mxu0 %v62_v19  ;;  %2938 = vmatpush3.bf16.msra.mxu0 %v2937_v30  ;;  %v2939_v34 = vpack.c.bf16 %v416_v33, %v415_v32  ;;  %v685_v30 = vld [vmem:[#allocation4 + $0x48] sm:$0xff] }
  0x5b   :  { %v2987_v43 = vpack.c.bf16 %v689_v48, %v685_v30  ;;  %v703_v48 = vld [vmem:[#allocation4 + $0xd8] sm:$0xff] }
  0x5c   :  { %2940 = vmatprep.subr.bf16.mxu0 %v2939_v34  ;;  %2970 = vmatpush3.bf16.msra.mxu1 %v2967_v53 }
  0x5d   :  { %229 = vmatmul.mubr.f32.gmra.mrb[10].mxu0 %v3576_v45  ;;  %v401_v45 = vld [vmem:[#allocation2 + $0x1e0] sm:$0xff]  ;;  %2972 = vmatprep.subr.bf16.mxu1 %v2971_v41 }
  0x5e   :  { %233 = vmatprep.mubr.f32.mxu0 %v61_v21  ;;  %2942 = vmatpush3.bf16.msra.mxu0 %v2941_v37  ;;  %v2945_v47 = vpack.c.bf16 %v402_v46, %v401_v45  ;;  %v691_v45 = vld [vmem:[#allocation4 + $0x78] sm:$0xff]  ;;  %v684_v46 = vld [vmem:[#allocation4 + $0x40] sm:$0xff] }
  0x5f   :  { %2944 = vmatprep.subr.bf16.mxu0 %v2943_v44  ;;  %v687_v44 = vld [vmem:[#allocation4 + $0x58] sm:$0xff] }
  0x60   :  { %2974 = vmatpush3.bf16.msra.mxu1 %v2971_v41 }
  0x61   :  { %234 = vmatmul.mubr.f32.gmra.mrb[12].mxu0 %v3585_v52  ;;  %v2975_v52 = vpack.c.bf16 %v434_v51, %v433_v50 }
  0x62   :  { %238 = vmatprep.mubr.f32.mxu0 %v68_v55  ;;  %2946 = vmatpush3.bf16.msra.mxu0 %v2945_v47 }
  0x63   :  { %2976 = vmatprep.subr.bf16.mxu1 %v2975_v52  ;;  %2948 = vmatprep.subr.bf16.mxu0 %v2947_v57  ;;  %v693_v57 = vld [vmem:[#allocation4 + $0x88] sm:$0xff] }
  0x64   :  { %2978 = vmatpush3.bf16.msra.mxu1 %v2975_v52 }
  0x65   :  { %239 = vmatmul.mubr.f32.gmra.mrb[14].mxu0 %v49_v2  ;;  %2980 = vmatprep.subr.bf16.mxu1 %v2979_v63  ;;  %v679_v2 = vld [vmem:[#allocation4 + $0x18] sm:$0xff] }
  0x66   :  { %2950 = vmatpush3.bf16.msra.mxu0 %v2949_v60  ;;  %v3047_v5 = vpack.c.bf16 %v683_v4, %v679_v2  ;;  %v3049_v60 = vpack.c.bf16 %v682_v40, %v678_v39  ;;  %v690_v2 = vld [vmem:[#allocation4 + $0x70] sm:$0xff]  ;;  %v2989_v4 = vpack.c.bf16 %v688_v56, %v684_v46  ;;  %v704_v40 = vld [vmem:[#allocation4 + $0xe0] sm:$0xff] }
  0x67   :  { %2984 = vmatprep.subr.bf16.mxu0 %v2983_v3  ;;  %v3051_v3 = vpack.c.bf16 %v691_v45, %v687_v44  ;;  %v706_v56 = vld [vmem:[#allocation4 + $0xf0] sm:$0xff] }
  0x68   :  { %2982 = vmatpush3.bf16.msra.mxu1 %v2979_v63 }
  0x69   :  { %3048 = vmatprep.subr.bf16.mxu1 %v3047_v5  ;;  %v2991_v5 = vpack.c.bf16 %v697_v58, %v693_v57 }
 0x11c   :  { %v2281_v6 = vpop.f32.mrb[0].mxu0 }
 0x11d   :  { %v2282_v7 = vpop.f32.mrb[1].mxu0 }
 0x11e   :  { %v2283_v9 = vadd.f32 %v2282_v7, %v2281_v6  ;;  %v2711_v10 = vpop.f32.mrb[0].mxu1  ;;  %v695_v6 = vld [vmem:[#allocation4 + $0x98] sm:$0xff] }
 0x11f   :  { %v310_v11 = vpop.f32.mrb[1].mxu1  ;;  %v699_v7 = vld [vmem:[#allocation4 + $0xb8] sm:$0xff] }
 0x120   :  { %v2284_v12 = vpop.f32.mrb[2].mxu0  ;;  %v206_v13 = vadd.f32 %v2283_v9, %v3626_v8  ;;  %v692_v9 = vld [vmem:[#allocation4 + $0x80] sm:$0xff] }
 0x121   :  { %v2285_v49 = vpop.f32.mrb[3].mxu0 }
 0x122   :  { %v2286_v14 = vadd.f32 %v2285_v49, %v2284_v12  ;;  %v311_v15 = vadd.f32 %v310_v11, %v206_v13  ;;  %v2714_v17 = vpop.f32.mrb[2].mxu1 }
 0x123   :  { %v320_v18 = vpop.f32.mrb[3].mxu1 }
 0x124   :  { %v211_v16 = vadd.f32 %v2286_v14, %v3626_v8  ;;  %v2287_v19 = vpop.f32.mrb[4].mxu0  ;;  %v3630_v20 = vmax.f32 %v311_v15, 0.0  ;;  %v696_v14 = vld [vmem:[#allocation4 + $0xa0] sm:$0xff]  ;;  %v701_v15 = vld [vmem:[#allocation4 + $0xc8] sm:$0xff] }
 0x125   :  { %v2288_v21 = vpop.f32.mrb[5].mxu0  ;;  %v2993_v29 = vpack.c.bf16 %v696_v14, %v692_v9 }
 0x126   :  { %v316_v55 = vadd.f32 %v2711_v10, %v211_v16  ;;  %v2289_v22 = vadd.f32 %v2288_v21, %v2287_v19  ;;  %v3632_v23 = vpop.f32.mrb[4].mxu1  ;;  %v357_v53 = vrot.slane %v3630_v20, 1  ;;  %v373_v32 = vrot.slane %v3630_v20, 2 }
 0x127   :  { %v3634_v24 = vpop.f32.mrb[5].mxu1  ;;  %v3053_v16 = vpack.c.bf16 %v690_v2, %v686_v1 }
 0x128   :  { %v3636_v26 = vmax.f32 %v316_v55, 0.0  ;;  %v2290_v27 = vpop.f32.mrb[6].mxu0  ;;  %v216_v28 = vadd.f32 %v2289_v22, %v3626_v8 }
 0x129   :  { %v2291_v31 = vpop.f32.mrb[7].mxu0 }
 0x12a   :  { %v321_v33 = vadd.f32 %v320_v18, %v216_v28  ;;  %v2292_v34 = vadd.f32 %v2291_v31, %v2290_v27  ;;  %v358_v35 = vrot.slane %v3636_v26, 1  ;;  %v374_v36 = vrot.slane %v3636_v26, 2  ;;  %v3643_v37 = vpop.f32.mrb[6].mxu1  ;;  %v698_v27 = vld [vmem:[#allocation4 + $0xb0] sm:$0xff]  ;;  %v707_v31 = vld [vmem:[#allocation4 + $0xf8] sm:$0xff] }
 0x12b   :  { %v3645_v41 = vpop.f32.mrb[7].mxu1  ;;  %v3055_v28 = vpack.c.bf16 %v699_v7, %v695_v6  ;;  %v3057_v45 = vpack.c.bf16 %v698_v27, %v694_v25  ;;  %v3059_v57 = vpack.c.bf16 %v707_v31, %v703_v48  ;;  %v716_v25 = vld [vmem:[#allocation4 + $0x140] sm:$0xff] }
 0x12c   :  { %v3647_v47 = vmax.f32 %v321_v33, 0.0  ;;  %v221_v50 = vadd.f32 %v2292_v34, %v3626_v8  ;;  %v2293_v51 = vpop.f32.mrb[8].mxu0  ;;  %v371_v52 = vsel %vm60_vm0, %v357_v53, %v358_v35  ;;  %v387_v54 = vsel %vm77_vm1, %v373_v32, %v374_v36  ;;  %v700_v33 = vld [vmem:[#allocation4 + $0xc0] sm:$0xff] }
 0x12d   :  { %v2294_v59 = vpop.f32.mrb[9].mxu0  ;;  %506 = vmatprep.mubr.f32.mxu0 %v371_v52  ;;  %2753 = vmatprep.mubr.f32.mxu1 %v387_v54  ;;  %v702_v54 = vld [vmem:[#allocation4 + $0xd0] sm:$0xff]  ;;  %v2997_v58 = vpack.c.bf16 %v704_v40, %v700_v33  ;;  %v720_v27 = vld [vmem:[#allocation4 + $0x160] sm:$0xff] }
 0x12e   :  { %v375_v61 = vrot.slane %v3647_v47, 2  ;;  %v326_v62 = vadd.f32 %v2714_v17, %v221_v50  ;;  %v2295_v63 = vadd.f32 %v2294_v59, %v2293_v51  ;;  %507 = vmatmul.mubr.f32.vlgmr.msra.gmra.mrb[16].mxu0 %v3630_v20  ;;  %v359_v0 = vrot.slane %v3647_v47, 1  ;;  %v705_v17 = vld [vmem:[#allocation4 + $0xe8] sm:$0xff] }
 0x12f   :  { %2986 = vmatpush1.bf16.msra.mxu0 %v2985_v42  ;;  %v2995_v30 = vpack.c.bf16 %v705_v17, %v701_v15  ;;  %v709_v42 = vld [vmem:[#allocation4 + $0x108] sm:$0xff]  ;;  %v3061_v7 = vpack.c.bf16 %v706_v56, %v702_v54  ;;  %v710_v15 = vld [vmem:[#allocation4 + $0x110] sm:$0xff] }
 0x130   :  { %v3661_v10 = vmax.f32 %v326_v62, 0.0  ;;  %v2296_v11 = vpop.f32.mrb[10].mxu0  ;;  %v226_v12 = vadd.f32 %v2295_v63, %v3626_v8  ;;  %v370_v13 = vsel %vm60_vm0, %v358_v35, %v359_v0  ;;  %v386_v49 = vsel %vm77_vm1, %v374_v36, %v375_v61  ;;  %2988 = vmatprep.subr.bf16.mxu0 %v2987_v43  ;;  %v713_v43 = vld [vmem:[#allocation4 + $0x128] sm:$0xff]  ;;  %v708_v62 = vld [vmem:[#allocation4 + $0x100] sm:$0xff]  ;;  %v714_v17 = vld [vmem:[#allocation4 + $0x130] sm:$0xff] }
 0x131   :  { %v2297_v18 = vpop.f32.mrb[11].mxu0  ;;  %511 = vmatprep.mubr.f32.mxu0 %v370_v13  ;;  %2754 = vmatmul.mubr.f32.vlgmr.msra.gmra.mrb[8].mxu1 %v386_v49  ;;  %v2999_v59 = vpack.c.bf16 %v713_v43, %v709_v42  ;;  %v722_v42 = vld [vmem:[#allocation4 + $0x170] sm:$0xff] }
 0x132   :  { %v331_v19 = vadd.f32 %v3634_v24, %v226_v12  ;;  %v2298_v21 = vadd.f32 %v2297_v18, %v2296_v11  ;;  %512 = vmatmul.mubr.f32.gmra.mrb[18].mxu0 %v3636_v26  ;;  %v360_v55 = vrot.slane %v3661_v10, 1  ;;  %v376_v22 = vrot.slane %v3661_v10, 2  ;;  %3050 = vmatpush1.bf16.msra.mxu1 %v3049_v60  ;;  %v711_v60 = vld [vmem:[#allocation4 + $0x118] sm:$0xff] }
 0x133   :  { %3052 = vmatprep.subr.bf16.mxu1 %v3051_v3  ;;  %2990 = vmatpush1.bf16.msra.mxu0 %v2989_v4  ;;  %v712_v3 = vld [vmem:[#allocation4 + $0x120] sm:$0xff]  ;;  %v717_v4 = vld [vmem:[#allocation4 + $0x148] sm:$0xff] }
 0x134   :  { %v3672_v34 = vmax.f32 %v331_v19, 0.0  ;;  %v231_v24 = vadd.f32 %v2298_v21, %v3626_v8  ;;  %v2299_v35 = vpop.f32.mrb[12].mxu0  ;;  %v369_v36 = vsel %vm60_vm0, %v359_v0, %v360_v55  ;;  %v385_v39 = vsel %vm77_vm1, %v375_v61, %v376_v22  ;;  %2992 = vmatprep.subr.bf16.mxu0 %v2991_v5  ;;  %v715_v61 = vld [vmem:[#allocation4 + $0x138] sm:$0xff]  ;;  %v721_v5 = vld [vmem:[#allocation4 + $0x168] sm:$0xff] }
 0x135   :  { %v2300_v44 = vpop.f32.mrb[13].mxu0  ;;  %516 = vmatprep.mubr.f32.mxu0 %v369_v36  ;;  %2756 = vmatprep.mubr.f32.mxu1 %v385_v39  ;;  %v3063_v49 = vpack.c.bf16 %v715_v61, %v711_v60  ;;  %v3001_v14 = vpack.c.bf16 %v712_v3, %v708_v62  ;;  %v3003_v18 = vpack.c.bf16 %v721_v5, %v717_v4  ;;  %v726_v61 = vld [vmem:[#allocation4 + $0x190] sm:$0xff]  ;;  %v741_v4 = vld [vmem:[#allocation4 + $0x208] sm:$0xff] }
 0x136   :  { %v361_v46 = vrot.slane %v3672_v34, 1  ;;  %v377_v50 = vrot.slane %v3672_v34, 2  ;;  %v336_v51 = vadd.f32 %v3632_v23, %v231_v24  ;;  %v2301_v52 = vadd.f32 %v2300_v44, %v2299_v35  ;;  %517 = vmatmul.mubr.f32.gmra.mrb[20].mxu0 %v3647_v47  ;;  %3054 = vmatpush1.bf16.msra.mxu1 %v3053_v16  ;;  %v719_v16 = vld [vmem:[#allocation4 + $0x158] sm:$0xff]  ;;  %v718_v35 = vld [vmem:[#allocation4 + $0x150] sm:$0xff] }
 0x137   :  { %3056 = vmatprep.subr.bf16.mxu1 %v3055_v28  ;;  %2994 = vmatpush1.bf16.msra.mxu0 %v2993_v29  ;;  %v725_v28 = vld [vmem:[#allocation4 + $0x188] sm:$0xff]  ;;  %v3005_v24 = vpack.c.bf16 %v720_v27, %v716_v25  ;;  %v731_v44 = vld [vmem:[#allocation4 + $0x1b8] sm:$0xff]  ;;  %v3069_v54 = vpack.c.bf16 %v722_v42, %v718_v35  ;;  %v730_v62 = vld [vmem:[#allocation4 + $0x1b0] sm:$0xff] }
 0x138   :  { %v354_v63 = vmax.f32 %v336_v51, 0.0  ;;  %v2302_v0 = vpop.f32.mrb[14].mxu0  ;;  %v236_v1 = vadd.f32 %v2301_v52, %v3626_v8  ;;  %v368_v23 = vsel %vm60_vm0, %v360_v55, %v361_v46  ;;  %v384_v2 = vsel %vm77_vm1, %v376_v22, %v377_v50  ;;  %2996 = vmatprep.subr.bf16.mxu0 %v2995_v30  ;;  %v723_v22 = vld [vmem:[#allocation4 + $0x178] sm:$0xff]  ;;  %v729_v29 = vld [vmem:[#allocation4 + $0x1a8] sm:$0xff]  ;;  %v756_v42 = vld [vmem:[#allocation4 + $0x280] sm:$0xff] }
 0x139   :  { %v2303_v6 = vpop.f32.mrb[15].mxu0  ;;  %521 = vmatprep.mubr.f32.mxu0 %v368_v23  ;;  %2757 = vmatmul.mubr.f32.gmra.mrb[10].mxu1 %v384_v2  ;;  %v3067_v33 = vpack.c.bf16 %v723_v22, %v719_v16  ;;  %v3007_v43 = vpack.c.bf16 %v729_v29, %v725_v28  ;;  %v733_v51 = vld [vmem:[#allocation4 + $0x1c8] sm:$0xff]  ;;  %v732_v23 = vld [vmem:[#allocation4 + $0x1c0] sm:$0xff]  ;;  %v3073_v5 = vpack.c.bf16 %v730_v62, %v726_v61  ;;  %v751_v22 = vld [vmem:[#allocation4 + $0x258] sm:$0xff] }
 0x13a   :  { %v341_v9 = vadd.f32 %v3645_v41, %v236_v1  ;;  %v2304_v11 = vadd.f32 %v2303_v6, %v2302_v0  ;;  %522 = vmatmul.mubr.f32.gmra.mrb[22].mxu0 %v3661_v10  ;;  %v362_v12 = vrot.slane %v354_v63, 1  ;;  %v378_v13 = vrot.slane %v354_v63, 2  ;;  %3058 = vmatpush1.bf16.msra.mxu1 %v3057_v45  ;;  %v728_v45 = vld [vmem:[#allocation4 + $0x1a0] sm:$0xff]  ;;  %v737_v52 = vld [vmem:[#allocation4 + $0x1e8] sm:$0xff]  ;;  %v739_v1 = vld [vmem:[#allocation4 + $0x1f8] sm:$0xff] }
 0x13b   :  { %3060 = vmatprep.subr.bf16.mxu1 %v3059_v57  ;;  %2998 = vmatpush1.bf16.msra.mxu0 %v2997_v58  ;;  %v3011_v0 = vpack.c.bf16 %v737_v52, %v733_v51  ;;  %v736_v2 = vld [vmem:[#allocation4 + $0x1e0] sm:$0xff]  ;;  %v755_v25 = vld [vmem:[#allocation4 + $0x278] sm:$0xff]  ;;  %v761_v35 = vld [vmem:[#allocation4 + $0x2a8] sm:$0xff] }
 0x13c   :  { %v355_v19 = vmax.f32 %v341_v9, 0.0  ;;  %v241_v21 = vadd.f32 %v2304_v11, %v3626_v8  ;;  %v367_v41 = vsel %vm60_vm0, %v361_v46, %v362_v12  ;;  %v383_v55 = vsel %vm77_vm1, %v377_v50, %v378_v13  ;;  %3000 = vmatprep.subr.bf16.mxu0 %v2999_v59  ;;  %v734_v9 = vld [vmem:[#allocation4 + $0x1d0] sm:$0xff]  ;;  %v748_v29 = vld [vmem:[#allocation4 + $0x240] sm:$0xff]  ;;  %v769_v51 = vld [vmem:[#allocation4 + $0x2e8] sm:$0xff] }
 0x13d   :  { %526 = vmatprep.mubr.f32.mxu0 %v367_v41  ;;  %2759 = vmatprep.mubr.f32.mxu1 %v383_v55  ;;  %v3065_v8 = vpack.c.bf16 %v714_v17, %v710_v15  ;;  %v738_v11 = vld [vmem:[#allocation4 + $0x1f0] sm:$0xff]  ;;  %v744_v15 = vld [vmem:[#allocation4 + $0x220] sm:$0xff]  ;;  %v749_v17 = vld [vmem:[#allocation4 + $0x248] sm:$0xff]  ;;  %v3083_v28 = vpack.c.bf16 %v755_v25, %v751_v22 }
 0x13e   :  { %v363_v30 = vrot.slane %v355_v19, 1  ;;  %v379_v48 = vrot.slane %v355_v19, 2  ;;  %v346_v31 = vadd.f32 %v3643_v37, %v241_v21  ;;  %527 = vmatmul.mubr.f32.gmra.mrb[24].mxu0 %v3672_v34  ;;  %3062 = vmatpush1.bf16.msra.mxu1 %v3061_v7  ;;  %v727_v37 = vld [vmem:[#allocation4 + $0x198] sm:$0xff]  ;;  %v724_v34 = vld [vmem:[#allocation4 + $0x180] sm:$0xff]  ;;  %v3013_v7 = vpack.c.bf16 %v736_v2, %v732_v23  ;;  %v742_v21 = vld [vmem:[#allocation4 + $0x210] sm:$0xff] }
 0x13f   :  { %3064 = vmatprep.subr.bf16.mxu1 %v3063_v49  ;;  %3002 = vmatpush1.bf16.msra.mxu0 %v3001_v14  ;;  %v3071_v56 = vpack.c.bf16 %v731_v44, %v727_v37  ;;  %v3009_v60 = vpack.c.bf16 %v728_v45, %v724_v34  ;;  %v747_v49 = vld [vmem:[#allocation4 + $0x238] sm:$0xff]  ;;  %v740_v14 = vld [vmem:[#allocation4 + $0x200] sm:$0xff]  ;;  %v746_v41 = vld [vmem:[#allocation4 + $0x230] sm:$0xff] }
 0x140   :  { %v356_v36 = vmax.f32 %v346_v31, 0.0  ;;  %v366_v39 = vsel %vm60_vm0, %v362_v12, %v363_v30  ;;  %v382_v40 = vsel %vm77_vm1, %v378_v13, %v379_v48  ;;  %3004 = vmatprep.subr.bf16.mxu0 %v3003_v18  ;;  %v743_v12 = vld [vmem:[#allocation4 + $0x218] sm:$0xff]  ;;  %v3077_v18 = vpack.c.bf16 %v738_v11, %v734_v9  ;;  %v758_v34 = vld [vmem:[#allocation4 + $0x290] sm:$0xff]  ;;  %v793_v22 = vld [vmem:[#allocation4 + $0x3a8] sm:$0xff] }
 0x141   :  { %531 = vmatprep.mubr.f32.mxu0 %v366_v39  ;;  %2760 = vmatmul.mubr.f32.gmra.mrb[12].mxu1 %v382_v40  ;;  %v3079_v16 = vpack.c.bf16 %v747_v49, %v743_v12  ;;  %v3081_v27 = vpack.c.bf16 %v746_v41, %v742_v21  ;;  %v763_v40 = vld [vmem:[#allocation4 + $0x2b8] sm:$0xff]  ;;  %v762_v45 = vld [vmem:[#allocation4 + $0x2b0] sm:$0xff]  ;;  %v781_v12 = vld [vmem:[#allocation4 + $0x348] sm:$0xff] }
 0x142   :  { %532 = vmatmul.mubr.f32.gmra.mrb[26].mxu0 %v354_v63  ;;  %v364_v46 = vrot.slane %v356_v36, 1  ;;  %v380_v50 = vrot.slane %v356_v36, 2  ;;  %3066 = vmatpush1.bf16.msra.mxu1 %v3065_v8  ;;  %v735_v63 = vld [vmem:[#allocation4 + $0x1d8] sm:$0xff]  ;;  %v754_v8 = vld [vmem:[#allocation4 + $0x270] sm:$0xff] }
 0x143   :  { %3068 = vmatprep.subr.bf16.mxu1 %v3067_v33  ;;  %3006 = vmatpush1.bf16.msra.mxu0 %v3005_v24  ;;  %v3075_v6 = vpack.c.bf16 %v739_v1, %v735_v63  ;;  %v757_v24 = vld [vmem:[#allocation4 + $0x288] sm:$0xff]  ;;  %v767_v52 = vld [vmem:[#allocation4 + $0x2d8] sm:$0xff]  ;;  %v766_v61 = vld [vmem:[#allocation4 + $0x2d0] sm:$0xff] }
 0x144   :  { %v365_v57 = vsel %vm60_vm0, %v363_v30, %v364_v46  ;;  %v381_v58 = vsel %vm77_vm1, %v379_v48, %v380_v50  ;;  %v388_v59 = vsel %vm77_vm1, %v380_v50, %v373_v32  ;;  %3008 = vmatprep.subr.bf16.mxu0 %v3007_v43  ;;  %v372_v3 = vsel %vm60_vm0, %v364_v46, %v357_v53  ;;  %v745_v32 = vld [vmem:[#allocation4 + $0x228] sm:$0xff]  ;;  %v752_v30 = vld [vmem:[#allocation4 + $0x260] sm:$0xff]  ;;  %v750_v48 = vld [vmem:[#allocation4 + $0x250] sm:$0xff] }
 0x145   :  { %536 = vmatprep.mubr.f32.mxu0 %v365_v57  ;;  %2762 = vmatprep.mubr.f32.mxu1 %v381_v58  ;;  %v3015_v13 = vpack.c.bf16 %v745_v32, %v741_v4  ;;  %v753_v53 = vld [vmem:[#allocation4 + $0x268] sm:$0xff]  ;;  %v3021_v31 = vpack.c.bf16 %v752_v30, %v748_v29  ;;  %v3085_v33 = vpack.c.bf16 %v754_v8, %v750_v48  ;;  %v760_v43 = vld [vmem:[#allocation4 + $0x2a0] sm:$0xff]  ;;  %v770_v62 = vld [vmem:[#allocation4 + $0x2f0] sm:$0xff] }
 0x146   :  { %537 = vmatmul.mubr.f32.gmra.mrb[28].mxu0 %v355_v19  ;;  %2763 = vmatmul.mubr.f32.gmra.mrb[14].mxu1 %v388_v59  ;;  %v3017_v19 = vpack.c.bf16 %v744_v15, %v740_v14  ;;  %v3019_v55 = vpack.c.bf16 %v753_v53, %v749_v17  ;;  %v3023_v39 = vpack.c.bf16 %v761_v35, %v757_v24  ;;  %v765_v50 = vld [vmem:[#allocation4 + $0x2c8] sm:$0xff]  ;;  %v764_v57 = vld [vmem:[#allocation4 + $0x2c0] sm:$0xff]  ;;  %v775_v2 = vld [vmem:[#allocation4 + $0x318] sm:$0xff] }
 0x147   :  { %541 = vmatprep.mubr.f32.mxu0 %v372_v3  ;;  %3070 = vmatpush1.bf16.msra.mxu1 %v3069_v54  ;;  %v3025_v44 = vpack.c.bf16 %v760_v43, %v756_v42  ;;  %v3089_v46 = vpack.c.bf16 %v762_v45, %v758_v34  ;;  %v3027_v54 = vpack.c.bf16 %v769_v51, %v765_v50  ;;  %v768_v58 = vld [vmem:[#allocation4 + $0x2e0] sm:$0xff]  ;;  %v777_v1 = vld [vmem:[#allocation4 + $0x328] sm:$0xff]  ;;  %v779_v3 = vld [vmem:[#allocation4 + $0x338] sm:$0xff] }
 0x148   :  { %3072 = vmatprep.subr.bf16.mxu1 %v3071_v56  ;;  %3010 = vmatpush1.bf16.msra.mxu0 %v3009_v60  ;;  %v771_v56 = vld [vmem:[#allocation4 + $0x2f8] sm:$0xff]  ;;  %v3029_v60 = vpack.c.bf16 %v768_v58, %v764_v57  ;;  %v3093_v63 = vpack.c.bf16 %v770_v62, %v766_v61  ;;  %v772_v4 = vld [vmem:[#allocation4 + $0x300] sm:$0xff]  ;;  %v3095_v32 = vpack.c.bf16 %v779_v3, %v775_v2  ;;  %v786_v21 = vld [vmem:[#allocation4 + $0x370] sm:$0xff] }
 0x149   :  { %3012 = vmatprep.subr.bf16.mxu0 %v3011_v0  ;;  %v3091_v59 = vpack.c.bf16 %v771_v56, %v767_v52  ;;  %v773_v0 = vld [vmem:[#allocation4 + $0x308] sm:$0xff]  ;;  %v783_v49 = vld [vmem:[#allocation4 + $0x358] sm:$0xff]  ;;  %v780_v17 = vld [vmem:[#allocation4 + $0x340] sm:$0xff] }
 0x14a   :  { %542 = vmatmul.mubr.f32.gmra.mrb[30].mxu0 %v356_v36  ;;  %v759_v36 = vld [vmem:[#allocation4 + $0x298] sm:$0xff]  ;;  %v3031_v23 = vpack.c.bf16 %v777_v1, %v773_v0  ;;  %v784_v53 = vld [vmem:[#allocation4 + $0x360] sm:$0xff]  ;;  %v794_v8 = vld [vmem:[#allocation4 + $0x3b0] sm:$0xff] }
 0x14b   :  { %3074 = vmatpush1.bf16.msra.mxu1 %v3073_v5  ;;  %v3087_v37 = vpack.c.bf16 %v763_v40, %v759_v36  ;;  %v776_v5 = vld [vmem:[#allocation4 + $0x320] sm:$0xff]  ;;  %v787_v15 = vld [vmem:[#allocation4 + $0x378] sm:$0xff]  ;;  %v797_v35 = vld [vmem:[#allocation4 + $0x3c8] sm:$0xff] }
 0x14c   :  { %3076 = vmatprep.subr.bf16.mxu1 %v3075_v6  ;;  %3014 = vmatpush1.bf16.msra.mxu0 %v3013_v7  ;;  %v774_v6 = vld [vmem:[#allocation4 + $0x310] sm:$0xff]  ;;  %v3033_v9 = vpack.c.bf16 %v776_v5, %v772_v4  ;;  %v788_v29 = vld [vmem:[#allocation4 + $0x380] sm:$0xff]  ;;  %v801_v36 = vld [vmem:[#allocation4 + $0x3e8] sm:$0xff] }
 0x14d   :  { %3016 = vmatprep.subr.bf16.mxu0 %v3015_v13  ;;  %v778_v7 = vld [vmem:[#allocation4 + $0x330] sm:$0xff]  ;;  %v785_v13 = vld [vmem:[#allocation4 + $0x368] sm:$0xff]  ;;  %v792_v48 = vld [vmem:[#allocation4 + $0x3a0] sm:$0xff]  ;;  %v3043_v40 = vpack.c.bf16 %v801_v36, %v797_v35 }
 0x14e   :  { %v3097_v11 = vpack.c.bf16 %v778_v7, %v774_v6  ;;  %v3035_v14 = vpack.c.bf16 %v785_v13, %v781_v12  ;;  %v803_v42 = vld [vmem:[#allocation4 + $0x3f8] sm:$0xff]  ;;  %v796_v43 = vld [vmem:[#allocation4 + $0x3c0] sm:$0xff]  ;;  %v798_v45 = vld [vmem:[#allocation4 + $0x3d0] sm:$0xff] }
 0x14f   :  { %3078 = vmatpush1.bf16.msra.mxu1 %v3077_v18  ;;  %v3099_v18 = vpack.c.bf16 %v787_v15, %v783_v49  ;;  %v1014_v51 = vld [vmem:[#allocation2 + $0x700] sm:$0xff]  ;;  %v1015_v52 = vld [vmem:[#allocation2 + $0x708] sm:$0xff]  ;;  %v1048_v35 = vld [vmem:[#allocation2 + $0x810] sm:$0xff] }
 0x150   :  { %3080 = vmatprep.subr.bf16.mxu1 %v3079_v16  ;;  %3018 = vmatpush1.bf16.msra.mxu0 %v3017_v19  ;;  %v3037_v16 = vpack.c.bf16 %v784_v53, %v780_v17  ;;  %v782_v19 = vld [vmem:[#allocation4 + $0x350] sm:$0xff]  ;;  %v3111_v56 = vpack.c.bf16 %v1015_v52, %v1014_v51  ;;  %v1047_v57 = vld [vmem:[#allocation2 + $0x808] sm:$0xff]  ;;  %v3713_v61 = vld [vmem:[#allocation2 + $0x981] ss:$0 sm:$0xff] }
 0x151   :  { %3020 = vmatprep.subr.bf16.mxu0 %v3019_v55  ;;  %v3101_v41 = vpack.c.bf16 %v786_v21, %v782_v19  ;;  %v789_v55 = vld [vmem:[#allocation4 + $0x388] sm:$0xff]  ;;  %v1049_v36 = vld [vmem:[#allocation2 + $0x818] sm:$0xff] }
 0x152   :  { %v3039_v25 = vpack.c.bf16 %v793_v22, %v789_v55 }
 0x153   :  { %3082 = vmatpush1.bf16.msra.mxu1 %v3081_v27  ;;  %v791_v27 = vld [vmem:[#allocation4 + $0x398] sm:$0xff] }
 0x154   :  { %3084 = vmatprep.subr.bf16.mxu1 %v3083_v28  ;;  %3022 = vmatpush1.bf16.msra.mxu0 %v3021_v31  ;;  %v795_v28 = vld [vmem:[#allocation4 + $0x3b8] sm:$0xff]  ;;  %v790_v31 = vld [vmem:[#allocation4 + $0x390] sm:$0xff] }
 0x155   :  { %3024 = vmatprep.subr.bf16.mxu0 %v3023_v39  ;;  %v3103_v30 = vpack.c.bf16 %v795_v28, %v791_v27  ;;  %v3105_v24 = vpack.c.bf16 %v794_v8, %v790_v31  ;;  %v799_v39 = vld [vmem:[#allocation4 + $0x3d8] sm:$0xff]  ;;  %v999_v28 = vld [vmem:[#allocation2 + $0x688] sm:$0xff]  ;;  %v1016_v31 = vld [vmem:[#allocation2 + $0x710] sm:$0xff] }
 0x156   :  { %v998_v27 = vld [vmem:[#allocation2 + $0x680] sm:$0xff] }
 0x157   :  { %3086 = vmatpush1.bf16.msra.mxu1 %v3085_v33  ;;  %v3041_v33 = vpack.c.bf16 %v792_v48, %v788_v29  ;;  %v1031_v48 = vld [vmem:[#allocation2 + $0x788] sm:$0xff] }
 0x158   :  { %3088 = vmatprep.subr.bf16.mxu1 %v3087_v37  ;;  %3026 = vmatpush1.bf16.msra.mxu0 %v3025_v44  ;;  %v800_v37 = vld [vmem:[#allocation4 + $0x3e0] sm:$0xff]  ;;  %v3107_v44 = vpack.c.bf16 %v803_v42, %v799_v39 }
 0x159   :  { %3028 = vmatprep.subr.bf16.mxu0 %v3027_v54  ;;  %v3045_v34 = vpack.c.bf16 %v800_v37, %v796_v43  ;;  %v1046_v54 = vld [vmem:[#allocation2 + $0x800] sm:$0xff]  ;;  %v3113_v37 = vpack.c.bf16 %v999_v28, %v998_v27  ;;  %v1005_v27 = vld [vmem:[#allocation2 + $0x6b8] sm:$0xff] }
 0x15a   :  { %v3143_v58 = vpack.c.bf16 %v1047_v57, %v1046_v54  ;;  %v3147_v54 = vpack.c.bf16 %v1049_v36, %v1048_v35  ;;  %v1033_v57 = vld [vmem:[#allocation2 + $0x798] sm:$0xff]  ;;  %v1055_v35 = vld [vmem:[#allocation2 + $0x848] sm:$0xff] }
 0x15b   :  { %3090 = vmatpush1.bf16.msra.mxu1 %v3089_v46  ;;  %v802_v46 = vld [vmem:[#allocation4 + $0x3f0] sm:$0xff] }
 0x15c   :  { %3092 = vmatprep.subr.bf16.mxu1 %v3091_v59  ;;  %3030 = vmatpush1.bf16.msra.mxu0 %v3029_v60  ;;  %v3109_v50 = vpack.c.bf16 %v802_v46, %v798_v45  ;;  %v1001_v45 = vld [vmem:[#allocation2 + $0x698] sm:$0xff] }
 0x15d   :  { %3032 = vmatprep.subr.bf16.mxu0 %v3031_v23 }
 0x15f   :  { %3094 = vmatpush1.bf16.msra.mxu1 %v3093_v63 }
 0x160   :  { %3096 = vmatprep.subr.bf16.mxu1 %v3095_v32  ;;  %3034 = vmatpush1.bf16.msra.mxu0 %v3033_v9 }
 0x161   :  { %3036 = vmatprep.subr.bf16.mxu0 %v3035_v14 }
 0x163   :  { %3098 = vmatpush1.bf16.msra.mxu1 %v3097_v11 }
 0x164   :  { %3100 = vmatprep.subr.bf16.mxu1 %v3099_v18  ;;  %3038 = vmatpush1.bf16.msra.mxu0 %v3037_v16 }
 0x165   :  { %3040 = vmatprep.subr.bf16.mxu0 %v3039_v25 }
 0x167   :  { %3102 = vmatpush1.bf16.msra.mxu1 %v3101_v41 }
 0x168   :  { %3104 = vmatprep.subr.bf16.mxu1 %v3103_v30  ;;  %3042 = vmatpush1.bf16.msra.mxu0 %v3041_v33  ;;  %v1030_v30 = vld [vmem:[#allocation2 + $0x780] sm:$0xff] }
 0x169   :  { %3044 = vmatprep.subr.bf16.mxu0 %v3043_v40 }
 0x16b   :  { %3106 = vmatpush1.bf16.msra.mxu1 %v3105_v24  ;;  %v1017_v24 = vld [vmem:[#allocation2 + $0x718] sm:$0xff] }
 0x16c   :  { %3108 = vmatprep.subr.bf16.mxu1 %v3107_v44  ;;  %3046 = vmatpush1.bf16.msra.mxu0 %v3045_v34  ;;  %v3145_v44 = vpack.c.bf16 %v1031_v48, %v1030_v30  ;;  %v1000_v34 = vld [vmem:[#allocation2 + $0x690] sm:$0xff]  ;;  %v3115_v52 = vpack.c.bf16 %v1017_v24, %v1016_v31  ;;  %v1037_v31 = vld [vmem:[#allocation2 + $0x7b8] sm:$0xff]  ;;  %v1054_v24 = vld [vmem:[#allocation2 + $0x840] sm:$0xff] }
 0x16d   :  { %3112 = vmatprep.subr.bf16.mxu0 %v3111_v56  ;;  %v1032_v56 = vld [vmem:[#allocation2 + $0x790] sm:$0xff] }
 0x16e   :  { %v1036_v48 = vld [vmem:[#allocation2 + $0x7b0] sm:$0xff] }
 0x16f   :  { %3110 = vmatpush1.bf16.msra.mxu1 %v3109_v50 }
 0x170   :  { %3144 = vmatprep.subr.bf16.mxu1 %v3143_v58  ;;  %v1018_v58 = vld [vmem:[#allocation2 + $0x720] sm:$0xff] }
 0x201   :  { %v2361_v59 = vpop.f32.mrb[16].mxu0 }
 0x202   :  { %v2362_v60 = vpop.f32.mrb[17].mxu0 }
 0x203   :  { %v2363_v62 = vadd.f32 %v2362_v60, %v2361_v59 }
 0x204   :  { %v2755_v63 = vpop.f32.mrb[8].mxu1 }
 0x205   :  { %v2364_v0 = vpop.f32.mrb[18].mxu0  ;;  %v509_v1 = vadd.f32 %v2363_v62, %v3713_v61  ;;  %v613_v23 = vpop.f32.mrb[9].mxu1  ;;  %v1019_v62 = vld [vmem:[#allocation2 + $0x728] sm:$0xff] }
 0x206   :  { %v2365_v2 = vpop.f32.mrb[19].mxu0 }
 0x207   :  { %v614_v3 = vadd.f32 %v613_v23, %v509_v1  ;;  %v2366_v4 = vadd.f32 %v2365_v2, %v2364_v0  ;;  %v1051_v0 = vld [vmem:[#allocation2 + $0x828] sm:$0xff] }
 0x209   :  { %v514_v32 = vadd.f32 %v2366_v4, %v3713_v61  ;;  %v2367_v5 = vpop.f32.mrb[20].mxu0  ;;  %v3727_v46 = vmax.f32 %v614_v3, 0.0  ;;  %v3117_v3 = vpack.c.bf16 %v1001_v45, %v1000_v34  ;;  %v3149_v4 = vpack.c.bf16 %v1033_v57, %v1032_v56  ;;  %v1038_v34 = vld [vmem:[#allocation2 + $0x7c0] sm:$0xff]  ;;  %v1039_v45 = vld [vmem:[#allocation2 + $0x7c8] sm:$0xff]  ;;  %v1008_v57 = vld [vmem:[#allocation2 + $0x6d0] sm:$0xff] }
 0x20a   :  { %v2368_v6 = vpop.f32.mrb[21].mxu0  ;;  %v3161_v56 = vpack.c.bf16 %v1039_v45, %v1038_v34  ;;  %v3766_v45 = vld [vmem:[#allocation4 + $0x430] sm:$0xff] }
 0x20b   :  { %v2369_v7 = vadd.f32 %v2368_v6, %v2367_v5  ;;  %v619_v9 = vadd.f32 %v2755_v63, %v514_v32  ;;  %v1050_v63 = vld [vmem:[#allocation2 + $0x820] sm:$0xff]  ;;  %v1003_v5 = vld [vmem:[#allocation2 + $0x6a8] sm:$0xff] }
 0x20c   :  { %v2758_v11 = vpop.f32.mrb[10].mxu1  ;;  %v1002_v32 = vld [vmem:[#allocation2 + $0x6a0] sm:$0xff] }
 0x20d   :  { %v2370_v12 = vpop.f32.mrb[22].mxu0  ;;  %v519_v13 = vadd.f32 %v2369_v7, %v3713_v61  ;;  %v623_v49 = vpop.f32.mrb[11].mxu1  ;;  %v3732_v7 = vmax.f32 %v619_v9, 0.0 }
 0x20e   :  { %v2371_v14 = vpop.f32.mrb[23].mxu0 }
 0x20f   :  { %v3718_v15 = vadd.f32 %v623_v49, %v519_v13  ;;  %v2372_v17 = vadd.f32 %v2371_v14, %v2370_v12  ;;  %v3151_v12 = vpack.c.bf16 %v1051_v0, %v1050_v63  ;;  %v1034_v13 = vld [vmem:[#allocation2 + $0x7a0] sm:$0xff]  ;;  %v1035_v49 = vld [vmem:[#allocation2 + $0x7a8] sm:$0xff]  ;;  %v1020_v14 = vld [vmem:[#allocation2 + $0x730] sm:$0xff] }
 0x210   :  { %v1041_v63 = vld [vmem:[#allocation2 + $0x7d8] sm:$0xff]  ;;  %v1026_v0 = vld [vmem:[#allocation2 + $0x760] sm:$0xff] }
 0x211   :  { %v524_v53 = vadd.f32 %v2372_v17, %v3713_v61  ;;  %v2373_v18 = vpop.f32.mrb[24].mxu0  ;;  %v3738_v28 = vmax.f32 %v3718_v15, 0.0 }
 0x212   :  { %v2374_v16 = vpop.f32.mrb[25].mxu0 }
 0x213   :  { %v2375_v19 = vadd.f32 %v2374_v16, %v2373_v18  ;;  %v3721_v21 = vadd.f32 %v2758_v11, %v524_v53  ;;  %v3119_v11 = vpack.c.bf16 %v1019_v62, %v1018_v58  ;;  %v1021_v18 = vld [vmem:[#allocation2 + $0x738] sm:$0xff]  ;;  %v1052_v16 = vld [vmem:[#allocation2 + $0x830] sm:$0xff] }
 0x214   :  { %v2761_v41 = vpop.f32.mrb[12].mxu1  ;;  %v1009_v58 = vld [vmem:[#allocation2 + $0x6d8] sm:$0xff]  ;;  %v1040_v62 = vld [vmem:[#allocation2 + $0x7d0] sm:$0xff] }
 0x215   :  { %v2376_v55 = vpop.f32.mrb[26].mxu0  ;;  %v529_v22 = vadd.f32 %v2375_v19, %v3713_v61  ;;  %v633_v25 = vpop.f32.mrb[13].mxu1  ;;  %v1053_v19 = vld [vmem:[#allocation2 + $0x838] sm:$0xff] }
 0x216   :  { %v2377_v29 = vpop.f32.mrb[27].mxu0  ;;  %v3155_v30 = vpack.c.bf16 %v1053_v19, %v1052_v16  ;;  %v1061_v19 = vld [vmem:[#allocation2 + $0x878] sm:$0xff] }
 0x217   :  { %v634_v8 = vadd.f32 %v633_v25, %v529_v22  ;;  %v2378_v33 = vadd.f32 %v2377_v29, %v2376_v55  ;;  %v3121_v55 = vpack.c.bf16 %v1003_v5, %v1002_v32  ;;  %v3153_v22 = vpack.c.bf16 %v1035_v49, %v1034_v13  ;;  %v1004_v25 = vld [vmem:[#allocation2 + $0x6b0] sm:$0xff]  ;;  %v1010_v32 = vld [vmem:[#allocation2 + $0x6e0] sm:$0xff]  ;;  %v1043_v13 = vld [vmem:[#allocation2 + $0x7e8] sm:$0xff] }
 0x218   :  { %v3123_v29 = vpack.c.bf16 %v1021_v18, %v1020_v14  ;;  %v3125_v36 = vpack.c.bf16 %v1005_v27, %v1004_v25  ;;  %v1060_v18 = vld [vmem:[#allocation2 + $0x870] sm:$0xff]  ;;  %v1045_v27 = vld [vmem:[#allocation2 + $0x7f8] sm:$0xff] }
 0x219   :  { %v656_v39 = vmax.f32 %v634_v8, 0.0  ;;  %v534_v40 = vadd.f32 %v2378_v33, %v3713_v61  ;;  %v2379_v42 = vpop.f32.mrb[28].mxu0  ;;  %v3725_v43 = vpop.f32.mrb[14].mxu1  ;;  %v1022_v8 = vld [vmem:[#allocation2 + $0x740] sm:$0xff]  ;;  %v1023_v33 = vld [vmem:[#allocation2 + $0x748] sm:$0xff]  ;;  %v1044_v25 = vld [vmem:[#allocation2 + $0x7f0] sm:$0xff] }
 0x21a   :  { %v2380_v50 = vpop.f32.mrb[29].mxu0  ;;  %v643_v51 = vpop.f32.mrb[15].mxu1 }
 0x21b   :  { %v2381_v59 = vadd.f32 %v2380_v50, %v2379_v42  ;;  %868 = vmatprep.mubr.f32.mxu0 %v656_v39  ;;  %957 = vmatprep.mubr.f32.mxu1 %v656_v39  ;;  %v639_v60 = vadd.f32 %v2761_v41, %v534_v40  ;;  %v3157_v39 = vpack.c.bf16 %v1037_v31, %v1036_v48  ;;  %v1006_v40 = vld [vmem:[#allocation2 + $0x6c0] sm:$0xff]  ;;  %v1007_v42 = vld [vmem:[#allocation2 + $0x6c8] sm:$0xff]  ;;  %v1024_v50 = vld [vmem:[#allocation2 + $0x750] sm:$0xff] }
 0x21c   :  { %869 = vmatmul.mubr.f32.vlgmr.msra.gmra.mrb[32].mxu0 %v3727_v46  ;;  %958 = vmatmul.mubr.f32.vlgmr.msra.gmra.mrb[16].mxu1 %v3727_v46  ;;  %v3750_v48 = vld [vmem:[#allocation4 + $0x418] sm:$0xff]  ;;  %v3752_v31 = vld [vmem:[#allocation4 + $0x400] sm:$0xff] }
 0x21d   :  { %v539_v1 = vadd.f32 %v2381_v59, %v3713_v61  ;;  %v2382_v23 = vpop.f32.mrb[30].mxu0  ;;  %v657_v2 = vmax.f32 %v639_v60, 0.0  ;;  %3114 = vmatpush3.bf16.msra.mxu0 %v3113_v37  ;;  %3146 = vmatpush3.bf16.msra.mxu1 %v3145_v44  ;;  %v3744_v37 = vmax.f32 %v3721_v21, 0.0  ;;  %v3159_v44 = vpack.c.bf16 %v1055_v35, %v1054_v24 }
 0x21e   :  { %v2383_v6 = vpop.f32.mrb[31].mxu0  ;;  %3116 = vmatprep.subr.bf16.mxu0 %v3115_v52  ;;  %3148 = vmatprep.subr.bf16.mxu1 %v3147_v54  ;;  %v1056_v52 = vld [vmem:[#allocation2 + $0x850] sm:$0xff]  ;;  %v1057_v54 = vld [vmem:[#allocation2 + $0x858] sm:$0xff]  ;;  %v3129_v21 = vpack.c.bf16 %v1007_v42, %v1006_v40 }
 0x21f   :  { %v644_v17 = vadd.f32 %v643_v51, %v539_v1  ;;  %v2384_v53 = vadd.f32 %v2383_v6, %v2382_v23  ;;  %874 = vmatprep.mubr.f32.mxu0 %v657_v2  ;;  %963 = vmatprep.mubr.f32.mxu1 %v657_v2  ;;  %v1025_v51 = vld [vmem:[#allocation2 + $0x758] sm:$0xff]  ;;  %v3163_v60 = vpack.c.bf16 %v1057_v54, %v1056_v52  ;;  %v1027_v1 = vld [vmem:[#allocation2 + $0x768] sm:$0xff]  ;;  %v1058_v23 = vld [vmem:[#allocation2 + $0x860] sm:$0xff] }
 0x220   :  { %875 = vmatmul.mubr.f32.gmra.mrb[34].mxu0 %v3732_v7  ;;  %964 = vmatmul.mubr.f32.gmra.mrb[18].mxu1 %v3732_v7  ;;  %v3131_v59 = vpack.c.bf16 %v1025_v51, %v1024_v50  ;;  %v1059_v2 = vld [vmem:[#allocation2 + $0x868] sm:$0xff]  ;;  %v3135_v5 = vpack.c.bf16 %v1027_v1, %v1026_v0  ;;  %v3760_v42 = vld [vmem:[#allocation4 + $0x428] sm:$0xff] }
 0x221   :  { %v658_v9 = vmax.f32 %v644_v17, 0.0  ;;  %v544_v41 = vadd.f32 %v2384_v53, %v3713_v61  ;;  %3118 = vmatpush3.bf16.msra.mxu0 %v3117_v3  ;;  %3150 = vmatpush3.bf16.msra.mxu1 %v3149_v4  ;;  %v3133_v3 = vpack.c.bf16 %v1009_v58, %v1008_v57  ;;  %v3165_v4 = vpack.c.bf16 %v1041_v63, %v1040_v62  ;;  %v1028_v17 = vld [vmem:[#allocation2 + $0x770] sm:$0xff]  ;;  %v1029_v53 = vld [vmem:[#allocation2 + $0x778] sm:$0xff] }
 0x222   :  { %3120 = vmatprep.subr.bf16.mxu0 %v3119_v11  ;;  %3152 = vmatprep.subr.bf16.mxu1 %v3151_v12  ;;  %v3167_v6 = vpack.c.bf16 %v1059_v2, %v1058_v23  ;;  %v1011_v11 = vld [vmem:[#allocation2 + $0x6e8] sm:$0xff]  ;;  %v1042_v12 = vld [vmem:[#allocation2 + $0x7e0] sm:$0xff]  ;;  %v3139_v16 = vpack.c.bf16 %v1029_v53, %v1028_v17  ;;  %v3772_v58 = vld [vmem:[#allocation4 + $0x448] sm:$0xff] }
 0x223   :  { %880 = vmatprep.mubr.f32.mxu0 %v658_v9  ;;  %969 = vmatprep.mubr.f32.mxu1 %v658_v9  ;;  %v649_v61 = vadd.f32 %v3725_v43, %v544_v41  ;;  %v3127_v43 = vpack.c.bf16 %v1023_v33, %v1022_v8  ;;  %v3137_v49 = vpack.c.bf16 %v1011_v11, %v1010_v32  ;;  %v1012_v9 = vld [vmem:[#allocation2 + $0x6f0] sm:$0xff]  ;;  %v1013_v41 = vld [vmem:[#allocation2 + $0x6f8] sm:$0xff]  ;;  %v3788_v11 = vld [vmem:[#allocation4 + $0x460] sm:$0xff] }
 0x224   :  { %881 = vmatmul.mubr.f32.gmra.mrb[36].mxu0 %v3738_v28  ;;  %970 = vmatmul.mubr.f32.gmra.mrb[20].mxu1 %v3738_v28  ;;  %v3169_v14 = vpack.c.bf16 %v1043_v13, %v1042_v12  ;;  %v3778_v63 = vld [vmem:[#allocation4 + $0x450] sm:$0xff] }
 0x225   :  { %v659_v15 = vmax.f32 %v649_v61, 0.0  ;;  %3122 = vmatpush3.bf16.msra.mxu0 %v3121_v55  ;;  %3154 = vmatpush3.bf16.msra.mxu1 %v3153_v22  ;;  %v3171_v55 = vpack.c.bf16 %v1061_v19, %v1060_v18  ;;  %v3141_v22 = vpack.c.bf16 %v1013_v41, %v1012_v9  ;;  %v3754_v61 = vld [vmem:[#allocation4 + $0x410] sm:$0xff]  ;;  %v1232_v9 = vld [vmem:[#allocation2 + $0x900] sm:$0xff]  ;;  %v1340_v41 = vld [vmem:[#allocation4 + $0x488] sm:$0xff] }
 0x226   :  { %3124 = vmatprep.subr.bf16.mxu0 %v3123_v29  ;;  %3156 = vmatprep.subr.bf16.mxu1 %v3155_v30  ;;  %v3173_v29 = vpack.c.bf16 %v1045_v27, %v1044_v25  ;;  %v3748_v30 = vld [vmem:[#allocation4 + $0x408] sm:$0xff]  ;;  %v3790_v13 = vld [vmem:[#allocation4 + $0x470] sm:$0xff]  ;;  %v1339_v25 = vld [vmem:[#allocation4 + $0x480] sm:$0xff] }
 0x227   :  { %886 = vmatprep.mubr.f32.mxu0 %v659_v15  ;;  %975 = vmatprep.mubr.f32.mxu1 %v659_v15  ;;  %v1343_v27 = vld [vmem:[#allocation4 + $0x4a0] sm:$0xff] }
 0x228   :  { %887 = vmatmul.mubr.f32.gmra.mrb[38].mxu0 %v3744_v37  ;;  %976 = vmatmul.mubr.f32.gmra.mrb[22].mxu1 %v3744_v37 }
 0x229   :  { %3126 = vmatpush3.bf16.msra.mxu0 %v3125_v36  ;;  %3158 = vmatpush3.bf16.msra.mxu1 %v3157_v39 }
 0x22a   :  { %3128 = vmatprep.subr.bf16.mxu0 %v3127_v43  ;;  %3160 = vmatprep.subr.bf16.mxu1 %v3159_v44  ;;  %v3762_v43 = vld [vmem:[#allocation4 + $0x438] sm:$0xff]  ;;  %v3764_v44 = vld [vmem:[#allocation4 + $0x420] sm:$0xff] }
 0x22d   :  { %3130 = vmatpush3.bf16.msra.mxu0 %v3129_v21  ;;  %3162 = vmatpush3.bf16.msra.mxu1 %v3161_v56 }
 0x22e   :  { %3132 = vmatprep.subr.bf16.mxu0 %v3131_v59  ;;  %3164 = vmatprep.subr.bf16.mxu1 %v3163_v60  ;;  %v3774_v59 = vld [vmem:[#allocation4 + $0x458] sm:$0xff]  ;;  %v3776_v60 = vld [vmem:[#allocation4 + $0x440] sm:$0xff] }
 0x231   :  { %3134 = vmatpush3.bf16.msra.mxu0 %v3133_v3  ;;  %3166 = vmatpush3.bf16.msra.mxu1 %v3165_v4 }
 0x232   :  { %3136 = vmatprep.subr.bf16.mxu0 %v3135_v5  ;;  %3168 = vmatprep.subr.bf16.mxu1 %v3167_v6  ;;  %v3784_v5 = vld [vmem:[#allocation4 + $0x468] sm:$0xff]  ;;  %v3786_v6 = vld [vmem:[#allocation4 + $0x478] sm:$0xff] }
 0x235   :  { %3138 = vmatpush3.bf16.msra.mxu0 %v3137_v49  ;;  %3170 = vmatpush3.bf16.msra.mxu1 %v3169_v14 }
 0x236   :  { %3140 = vmatprep.subr.bf16.mxu0 %v3139_v16  ;;  %3172 = vmatprep.subr.bf16.mxu1 %v3171_v55  ;;  %v1344_v55 = vld [vmem:[#allocation4 + $0x4a8] sm:$0xff] }
 0x239   :  { %3142 = vmatpush3.bf16.msra.mxu0 %v3141_v22  ;;  %3174 = vmatpush3.bf16.msra.mxu1 %v3173_v29  ;;  %v3183_v22 = vpack.c.bf16 %v1344_v55, %v1340_v41  ;;  %v3185_v29 = vpack.c.bf16 %v1343_v27, %v1339_v25  ;;  %v1387_v41 = vld [vmem:[#allocation4 + $0x600] sm:$0xff] }
 0x23a   :  { %v1391_v55 = vld [vmem:[#allocation4 + $0x620] sm:$0xff] }
 0x23b   :  { %3184 = vmatprep.subr.bf16.mxu1 %v3183_v22  ;;  %v3209_v22 = vpack.c.bf16 %v1391_v55, %v1387_v41  ;;  %v1354_v41 = vld [vmem:[#allocation4 + $0x4f8] sm:$0xff]  ;;  %v1233_v55 = vld [vmem:[#allocation2 + $0x908] sm:$0xff] }
 0x2ef   :  { %v870_v8 = vpop.f32.mrb[32].mxu0  ;;  %v959_v33 = vpop.f32.mrb[16].mxu1 }
 0x2f0   :  { %v872_v24 = vpop.f32.mrb[33].mxu0  ;;  %v961_v35 = vpop.f32.mrb[17].mxu1  ;;  %v982_v39 = vmul.f32 %v870_v8, %v3752_v31  ;;  %v984_v40 = vmul.f32 %v959_v33, %v3754_v61  ;;  %v1348_v8 = vld [vmem:[#allocation4 + $0x4c8] sm:$0xff] }
 0x2f1   :  { %v983_v15 = vmul.f32 %v872_v24, %v3748_v30  ;;  %v985_v36 = vmul.f32 %v961_v35, %v3750_v48  ;;  %v1352_v33 = vld [vmem:[#allocation4 + $0x4e8] sm:$0xff]  ;;  %v1347_v35 = vld [vmem:[#allocation4 + $0x4c0] sm:$0xff] }
 0x2f2   :  { %v3187_v24 = vpack.c.bf16 %v1352_v33, %v1348_v8 }
 0x2f3   :  { %v876_v34 = vpop.f32.mrb[34].mxu0  ;;  %v965_v50 = vpop.f32.mrb[18].mxu1  ;;  %1126 = vmatprep.mubr.f32.mxu0 %v983_v15  ;;  %1211 = vmatprep.mubr.f32.mxu1 %v985_v36  ;;  %v1351_v15 = vld [vmem:[#allocation4 + $0x4e0] sm:$0xff] }
 0x2f4   :  { %v878_v51 = vpop.f32.mrb[35].mxu0  ;;  %v967_v52 = vpop.f32.mrb[19].mxu1  ;;  %1127 = vmatmul.mubr.f32.vlgmr.msra.gmra.mrb[40].mxu0 %v982_v39  ;;  %1212 = vmatmul.mubr.f32.vlgmr.msra.gmra.mrb[24].mxu1 %v984_v40  ;;  %v986_v56 = vmul.f32 %v876_v34, %v3764_v44  ;;  %v988_v57 = vmul.f32 %v965_v50, %v3766_v45  ;;  %v3189_v36 = vpack.c.bf16 %v1351_v15, %v1347_v35  ;;  %v1356_v39 = vld [vmem:[#allocation4 + $0x508] sm:$0xff]  ;;  %v1355_v50 = vld [vmem:[#allocation4 + $0x500] sm:$0xff] }
 0x2f5   :  { %v987_v54 = vmul.f32 %v878_v51, %v3760_v42  ;;  %v989_v21 = vmul.f32 %v967_v52, %v3762_v43  ;;  %3186 = vmatpush1.bf16.msra.mxu1 %v3185_v29  ;;  %v1360_v40 = vld [vmem:[#allocation4 + $0x528] sm:$0xff]  ;;  %v1359_v51 = vld [vmem:[#allocation4 + $0x520] sm:$0xff] }
 0x2f6   :  { %3188 = vmatprep.subr.bf16.mxu1 %v3187_v24  ;;  %v3191_v34 = vpack.c.bf16 %v1360_v40, %v1356_v39  ;;  %v3193_v52 = vpack.c.bf16 %v1359_v51, %v1355_v50 }
 0x2f7   :  { %v882_v62 = vpop.f32.mrb[36].mxu0  ;;  %v971_v0 = vpop.f32.mrb[20].mxu1  ;;  %1131 = vmatprep.mubr.f32.mxu0 %v987_v54  ;;  %1216 = vmatprep.mubr.f32.mxu1 %v989_v21  ;;  %v1364_v54 = vld [vmem:[#allocation4 + $0x548] sm:$0xff] }
 0x2f8   :  { %v884_v1 = vpop.f32.mrb[37].mxu0  ;;  %v973_v23 = vpop.f32.mrb[21].mxu1  ;;  %1132 = vmatmul.mubr.f32.gmra.mrb[42].mxu0 %v986_v56  ;;  %1217 = vmatmul.mubr.f32.gmra.mrb[26].mxu1 %v988_v57  ;;  %v990_v4 = vmul.f32 %v882_v62, %v3776_v60  ;;  %v992_v32 = vmul.f32 %v971_v0, %v3778_v63  ;;  %v1368_v21 = vld [vmem:[#allocation4 + $0x568] sm:$0xff]  ;;  %v1363_v57 = vld [vmem:[#allocation4 + $0x540] sm:$0xff] }
 0x2f9   :  { %v991_v2 = vmul.f32 %v884_v1, %v3772_v58  ;;  %v993_v3 = vmul.f32 %v973_v23, %v3774_v59  ;;  %3190 = vmatpush1.bf16.msra.mxu1 %v3189_v36  ;;  %v3195_v56 = vpack.c.bf16 %v1368_v21, %v1364_v54  ;;  %v1367_v62 = vld [vmem:[#allocation4 + $0x560] sm:$0xff]  ;;  %v1372_v0 = vld [vmem:[#allocation4 + $0x588] sm:$0xff] }
 0x2fa   :  { %3192 = vmatprep.subr.bf16.mxu1 %v3191_v34  ;;  %v1376_v1 = vld [vmem:[#allocation4 + $0x5a8] sm:$0xff]  ;;  %v3197_v23 = vpack.c.bf16 %v1367_v62, %v1363_v57 }
 0x2fb   :  { %v888_v12 = vpop.f32.mrb[38].mxu0  ;;  %v977_v49 = vpop.f32.mrb[22].mxu1  ;;  %1136 = vmatprep.mubr.f32.mxu0 %v991_v2  ;;  %1221 = vmatprep.mubr.f32.mxu1 %v993_v3  ;;  %v3199_v2 = vpack.c.bf16 %v1376_v1, %v1372_v0  ;;  %v1371_v3 = vld [vmem:[#allocation4 + $0x580] sm:$0xff] }
 0x2fc   :  { %v890_v14 = vpop.f32.mrb[39].mxu0  ;;  %v979_v17 = vpop.f32.mrb[23].mxu1  ;;  %1137 = vmatmul.mubr.f32.gmra.mrb[44].mxu0 %v990_v4  ;;  %1222 = vmatmul.mubr.f32.gmra.mrb[28].mxu1 %v992_v32  ;;  %v994_v16 = vmul.f32 %v888_v12, %v3788_v11  ;;  %v996_v19 = vmul.f32 %v977_v49, %v3790_v13  ;;  %v1375_v4 = vld [vmem:[#allocation4 + $0x5a0] sm:$0xff]  ;;  %v1380_v32 = vld [vmem:[#allocation4 + $0x5c8] sm:$0xff] }
 0x2fd   :  { %v995_v53 = vmul.f32 %v890_v14, %v3784_v5  ;;  %v997_v18 = vmul.f32 %v979_v17, %v3786_v6  ;;  %3194 = vmatpush1.bf16.msra.mxu1 %v3193_v52  ;;  %v1384_v12 = vld [vmem:[#allocation4 + $0x5e8] sm:$0xff]  ;;  %v3201_v49 = vpack.c.bf16 %v1375_v4, %v1371_v3  ;;  %v1379_v17 = vld [vmem:[#allocation4 + $0x5c0] sm:$0xff] }
 0x2fe   :  { %3196 = vmatprep.subr.bf16.mxu1 %v3195_v56  ;;  %v3203_v14 = vpack.c.bf16 %v1384_v12, %v1380_v32 }
 0x2ff   :  { %1141 = vmatprep.mubr.f32.mxu0 %v995_v53  ;;  %1226 = vmatprep.mubr.f32.mxu1 %v997_v18  ;;  %v1383_v53 = vld [vmem:[#allocation4 + $0x5e0] sm:$0xff]  ;;  %v1388_v18 = vld [vmem:[#allocation4 + $0x608] sm:$0xff] }
 0x300   :  { %1142 = vmatmul.mubr.f32.gmra.mrb[46].mxu0 %v994_v16  ;;  %1227 = vmatmul.mubr.f32.gmra.mrb[30].mxu1 %v996_v19  ;;  %v1392_v16 = vld [vmem:[#allocation4 + $0x628] sm:$0xff]  ;;  %v3205_v19 = vpack.c.bf16 %v1383_v53, %v1379_v17 }
 0x301   :  { %2773 = vmatprep.mubr.msk.f32.mxu0 %vm1241_vm2, %v1232_v9  ;;  %3198 = vmatpush1.bf16.msra.mxu1 %v3197_v23  ;;  %v3207_v9 = vpack.c.bf16 %v1392_v16, %v1388_v18  ;;  %v1341_v16 = vld [vmem:[#allocation4 + $0x490] sm:$0xff] }
 0x302   :  { %3200 = vmatprep.subr.bf16.mxu1 %v3199_v2 }
 0x305   :  { %3202 = vmatpush1.bf16.msra.mxu1 %v3201_v49  ;;  %v1342_v49 = vld [vmem:[#allocation4 + $0x498] sm:$0xff] }
 0x306   :  { %3204 = vmatprep.subr.bf16.mxu1 %v3203_v14  ;;  %v1346_v14 = vld [vmem:[#allocation4 + $0x4b8] sm:$0xff] }
 0x307   :  { %v3215_v18 = vpack.c.bf16 %v1346_v14, %v1342_v49  ;;  %v1385_v49 = vld [vmem:[#allocation4 + $0x5f0] sm:$0xff]  ;;  %v1390_v14 = vld [vmem:[#allocation4 + $0x618] sm:$0xff] }
 0x309   :  { %3206 = vmatpush1.bf16.msra.mxu1 %v3205_v19  ;;  %v1345_v19 = vld [vmem:[#allocation4 + $0x4b0] sm:$0xff] }
 0x30a   :  { %3208 = vmatprep.subr.bf16.mxu1 %v3207_v9  ;;  %v1350_v9 = vld [vmem:[#allocation4 + $0x4d8] sm:$0xff] }
 0x30d   :  { %3210 = vmatpush1.bf16.msra.mxu1 %v3209_v22  ;;  %v3217_v22 = vpack.c.bf16 %v1345_v19, %v1341_v16  ;;  %v1389_v16 = vld [vmem:[#allocation4 + $0x610] sm:$0xff] }
 0x30e   :  { %v1393_v19 = vld [vmem:[#allocation4 + $0x630] sm:$0xff] }
 0x3c7   :  { %v2441_v25 = vpop.f32.mrb[40].mxu0  ;;  %v2485_v27 = vpop.f32.mrb[24].mxu1 }
 0x3c8   :  { %v2442_v29 = vpop.f32.mrb[41].mxu0  ;;  %v2486_v8 = vpop.f32.mrb[25].mxu1 }
 0x3c9   :  { %v2443_v33 = vadd.f32 %v2442_v29, %v2441_v25  ;;  %v2487_v24 = vadd.f32 %v2486_v8, %v2485_v27  ;;  %v1234_v25 = vld [vmem:[#allocation2 + $0x910] sm:$0xff]  ;;  %v3219_v27 = vpack.c.bf16 %v1354_v41, %v1350_v9  ;;  %v1349_v29 = vld [vmem:[#allocation4 + $0x4d0] sm:$0xff]  ;;  %v3241_v9 = vpack.c.bf16 %v1393_v19, %v1389_v16 }
 0x3ca   :  { %v1353_v8 = vld [vmem:[#allocation4 + $0x4f0] sm:$0xff]  ;;  %v1396_v41 = vld [vmem:[#allocation4 + $0x648] sm:$0xff] }
 0x3cb   :  { %v1214_v35 = vadd.f32 %v2487_v24, %v2443_v33  ;;  %v2444_v15 = vpop.f32.mrb[42].mxu0  ;;  %v2488_v36 = vpop.f32.mrb[26].mxu1  ;;  %v1358_v33 = vld [vmem:[#allocation4 + $0x518] sm:$0xff]  ;;  %v1631_v19 = vld [vmem:[#allocation2 + $0x590] sm:$0xff] }
 0x3cc   :  { %v2445_v39 = vpop.f32.mrb[43].mxu0  ;;  %v2489_v40 = vpop.f32.mrb[27].mxu1  ;;  %v1362_v24 = vld [vmem:[#allocation4 + $0x538] sm:$0xff] }
 0x3cd   :  { %v2446_v34 = vadd.f32 %v2445_v39, %v2444_v15  ;;  %v2490_v50 = vadd.f32 %v2489_v40, %v2488_v36  ;;  %v3221_v15 = vpack.c.bf16 %v1353_v8, %v1349_v29  ;;  %v3223_v36 = vpack.c.bf16 %v1362_v24, %v1358_v33  ;;  %v1357_v39 = vld [vmem:[#allocation4 + $0x510] sm:$0xff]  ;;  %v1395_v29 = vld [vmem:[#allocation4 + $0x640] sm:$0xff] }
 0x3ce   :  { %v1361_v40 = vld [vmem:[#allocation4 + $0x530] sm:$0xff]  ;;  %v1399_v8 = vld [vmem:[#allocation4 + $0x660] sm:$0xff] }
 0x3cf   :  { %v1219_v51 = vadd.f32 %v2490_v50, %v2446_v34  ;;  %v2447_v52 = vpop.f32.mrb[44].mxu0  ;;  %v2491_v54 = vpop.f32.mrb[28].mxu1  ;;  %v1366_v34 = vld [vmem:[#allocation4 + $0x558] sm:$0xff]  ;;  %v3213_v24 = vpack.c.bf16 %v1399_v8, %v1395_v29 }
 0x3d0   :  { %v2448_v21 = vpop.f32.mrb[45].mxu0  ;;  %v2492_v56 = vpop.f32.mrb[29].mxu1  ;;  %v1370_v50 = vld [vmem:[#allocation4 + $0x578] sm:$0xff] }
 0x3d1   :  { %v2449_v57 = vadd.f32 %v2448_v21, %v2447_v52  ;;  %v2493_v62 = vadd.f32 %v2492_v56, %v2491_v54  ;;  %v3175_v0 = vpack.c.bf16 %v1219_v51, %v1214_v35  ;;  %v1235_v35 = vld [vmem:[#allocation2 + $0x918] sm:$0xff]  ;;  %v3225_v51 = vpack.c.bf16 %v1361_v40, %v1357_v39  ;;  %v1374_v56 = vld [vmem:[#allocation4 + $0x598] sm:$0xff] }
 0x3d2   :  { %v3227_v52 = vpack.c.bf16 %v1370_v50, %v1366_v34  ;;  %v1365_v54 = vld [vmem:[#allocation4 + $0x550] sm:$0xff]  ;;  %v3469_v39 = vmov 0.0   ;;  %v1613_v40 = vld [vmem:[#allocation2 + $0x500] sm:$0xff]  ;;  %v1614_v34 = vld [vmem:[#allocation2 + $0x508] sm:$0xff] }
 0x3d3   :  { %v1224_v1 = vadd.f32 %v2493_v62, %v2449_v57  ;;  %v2450_v23 = vpop.f32.mrb[46].mxu0  ;;  %v2494_v2 = vpop.f32.mrb[30].mxu1  ;;  %3176 = vmatprep.subr.bf16.mxu0 %v3175_v0  ;;  %v1369_v21 = vld [vmem:[#allocation4 + $0x570] sm:$0xff]  ;;  %v1378_v57 = vld [vmem:[#allocation4 + $0x5b8] sm:$0xff]  ;;  %1467 = vmatprep.mubr.f32.mxu1 %v3469_v39 }
 0x3d4   :  { %v2451_v3 = vpop.f32.mrb[47].mxu0  ;;  %v2495_v4 = vpop.f32.mrb[31].mxu1  ;;  %3178 = vmatpush3.bf16.msra.mxu0 %v3175_v0  ;;  %v3229_v62 = vpack.c.bf16 %v1369_v21, %v1365_v54  ;;  %v3231_v0 = vpack.c.bf16 %v1378_v57, %v1374_v56  ;;  %v1645_v50 = vld [vmem:[#allocation2 + $0x600] sm:$0xff]  ;;  %v1598_v57 = vld [vmem:[#allocation2 + $0x488] sm:$0xff] }
 0x3d5   :  { %v2452_v32 = vadd.f32 %v2451_v3, %v2450_v23  ;;  %v2496_v12 = vadd.f32 %v2495_v4, %v2494_v2  ;;  %v1377_v23 = vld [vmem:[#allocation4 + $0x5b0] sm:$0xff]  ;;  %v1382_v2 = vld [vmem:[#allocation4 + $0x5d8] sm:$0xff] }
 0x3d6   :  { %v1386_v3 = vld [vmem:[#allocation4 + $0x5f8] sm:$0xff] }
 0x3d7   :  { %v1229_v17 = vadd.f32 %v2496_v12, %v2452_v32  ;;  %v3235_v32 = vpack.c.bf16 %v1386_v3, %v1382_v2  ;;  %v1381_v12 = vld [vmem:[#allocation4 + $0x5d0] sm:$0xff]  ;;  %v3802_v21 = vld [vmem:[#allocation2 + $0x984] ss:$0 sm:$0xff]  ;;  %v1647_v3 = vld [vmem:[#allocation2 + $0x610] sm:$0xff] }
 0x3d8   :  { %v1597_v56 = vld [vmem:[#allocation2 + $0x480] sm:$0xff]  ;;  %v1616_v2 = vld [vmem:[#allocation2 + $0x518] sm:$0xff] }
 0x3d9   :  { %v3179_v53 = vpack.c.bf16 %v1229_v17, %v1224_v1  ;;  %v1373_v1 = vld [vmem:[#allocation4 + $0x590] sm:$0xff]  ;;  %v1394_v17 = vld [vmem:[#allocation4 + $0x638] sm:$0xff] }
 0x3da   :  { %v3233_v4 = vpack.c.bf16 %v1377_v23, %v1373_v1  ;;  %v1615_v1 = vld [vmem:[#allocation2 + $0x510] sm:$0xff] }
 0x3db   :  { %3180 = vmatprep.subr.bf16.mxu0 %v3179_v53 }
 0x3dc   :  { %3182 = vmatpush3.bf16.msra.mxu0 %v3179_v53  ;;  %v3237_v53 = vpack.c.bf16 %v1385_v49, %v1381_v12  ;;  %v3249_v49 = vpack.c.bf16 %v1598_v57, %v1597_v56  ;;  %v1651_v56 = vld [vmem:[#allocation2 + $0x630] sm:$0xff]  ;;  %v1652_v57 = vld [vmem:[#allocation2 + $0x638] sm:$0xff] }
 0x3dd   :  { %3216 = vmatprep.subr.bf16.mxu0 %v3215_v18  ;;  %v3239_v18 = vpack.c.bf16 %v1394_v17, %v1390_v14  ;;  %v1599_v17 = vld [vmem:[#allocation2 + $0x490] sm:$0xff] }
 0x3df   :  { %2774 = vmatmul.mubr.msk.f32.vlgmr.msra.gmra.mrb[48].mxu0 %vm1241_vm2, %v1233_v55  ;;  %v1400_v55 = vld [vmem:[#allocation4 + $0x668] sm:$0xff] }
 0x3e0   :  { %2776 = vmatprep.mubr.msk.f32.mxu0 %vm1241_vm2, %v1234_v25  ;;  %3218 = vmatpush1.bf16.msra.mxu0 %v3217_v22  ;;  %v1398_v22 = vld [vmem:[#allocation4 + $0x658] sm:$0xff]  ;;  %v3211_v25 = vpack.c.bf16 %v1400_v55, %v1396_v41 }
 0x3e1   :  { %3220 = vmatprep.subr.bf16.mxu0 %v3219_v27  ;;  %v1402_v27 = vld [vmem:[#allocation4 + $0x678] sm:$0xff] }
 0x3e2   :  { %v3243_v33 = vpack.c.bf16 %v1402_v27, %v1398_v22  ;;  %3212 = vmatprep.subr.bf16.mxu1 %v3211_v25  ;;  %v1617_v41 = vld [vmem:[#allocation2 + $0x520] sm:$0xff]  ;;  %v1618_v22 = vld [vmem:[#allocation2 + $0x528] sm:$0xff] }
 0x3e3   :  { %2777 = vmatmul.mubr.msk.f32.gmra.mrb[50].mxu0 %vm1241_vm2, %v1235_v35  ;;  %v1397_v35 = vld [vmem:[#allocation4 + $0x650] sm:$0xff]  ;;  %3214 = vmatpush1.bf16.msra.mxu1 %v3213_v24  ;;  %v1649_v25 = vld [vmem:[#allocation2 + $0x620] sm:$0xff]  ;;  %v1650_v27 = vld [vmem:[#allocation2 + $0x628] sm:$0xff] }
 0x3e4   :  { %3222 = vmatpush1.bf16.msra.mxu0 %v3221_v15  ;;  %v1401_v15 = vld [vmem:[#allocation4 + $0x670] sm:$0xff]  ;;  %1556 = vmatprep.mubr.f32.mxu0 %v3469_v39 }
 0x3e5   :  { %3224 = vmatprep.subr.bf16.mxu0 %v3223_v36  ;;  %v3245_v36 = vpack.c.bf16 %v1401_v15, %v1397_v35  ;;  %v1601_v35 = vld [vmem:[#allocation2 + $0x4a0] sm:$0xff]  ;;  %v1602_v15 = vld [vmem:[#allocation2 + $0x4a8] sm:$0xff] }
 0x3e8   :  { %3226 = vmatpush1.bf16.msra.mxu0 %v3225_v51  ;;  %v3247_v51 = vpack.c.bf16 %v1614_v34, %v1613_v40  ;;  %v3287_v40 = vpack.c.bf16 %v1650_v27, %v1649_v25  ;;  %v1633_v34 = vld [vmem:[#allocation2 + $0x5a0] sm:$0xff]  ;;  %v1638_v27 = vld [vmem:[#allocation2 + $0x5c8] sm:$0xff] }
 0x3e9   :  { %3228 = vmatprep.subr.bf16.mxu0 %v3227_v52  ;;  %v1646_v52 = vld [vmem:[#allocation2 + $0x608] sm:$0xff]  ;;  %v1637_v25 = vld [vmem:[#allocation2 + $0x5c0] sm:$0xff] }
 0x3ea   :  { %v3279_v54 = vpack.c.bf16 %v1646_v52, %v1645_v50  ;;  %3248 = vmatprep.subr.bf16.mxu1 %v3247_v51  ;;  %v1634_v50 = vld [vmem:[#allocation2 + $0x5a8] sm:$0xff]  ;;  %v1619_v51 = vld [vmem:[#allocation2 + $0x530] sm:$0xff] }
 0x3ec   :  { %3230 = vmatpush1.bf16.msra.mxu0 %v3229_v62  ;;  %v1629_v62 = vld [vmem:[#allocation2 + $0x580] sm:$0xff] }
 0x3ed   :  { %3232 = vmatprep.subr.bf16.mxu0 %v3231_v0  ;;  %v1630_v0 = vld [vmem:[#allocation2 + $0x588] sm:$0xff] }
 0x3ee   :  { %v3281_v14 = vpack.c.bf16 %v1630_v0, %v1629_v62  ;;  %v3257_v62 = vpack.c.bf16 %v1602_v15, %v1601_v35  ;;  %v3289_v0 = vpack.c.bf16 %v1634_v50, %v1633_v34  ;;  %v1608_v35 = vld [vmem:[#allocation2 + $0x4d8] sm:$0xff]  ;;  %v1625_v50 = vld [vmem:[#allocation2 + $0x560] sm:$0xff] }
 0x3ef   :  { %v1640_v34 = vld [vmem:[#allocation2 + $0x5d8] sm:$0xff] }
 0x3f0   :  { %3234 = vmatpush1.bf16.msra.mxu0 %v3233_v4  ;;  %v1648_v4 = vld [vmem:[#allocation2 + $0x618] sm:$0xff] }
 0x3f1   :  { %3236 = vmatprep.subr.bf16.mxu0 %v3235_v32  ;;  %v3283_v16 = vpack.c.bf16 %v1648_v4, %v1647_v3  ;;  %v3291_v3 = vpack.c.bf16 %v1652_v57, %v1651_v56  ;;  %v1635_v4 = vld [vmem:[#allocation2 + $0x5b0] sm:$0xff] }
 0x3f4   :  { %3238 = vmatpush1.bf16.msra.mxu0 %v3237_v53  ;;  %v1600_v53 = vld [vmem:[#allocation2 + $0x498] sm:$0xff] }
 0x3f5   :  { %3240 = vmatprep.subr.bf16.mxu0 %v3239_v18  ;;  %v3251_v18 = vpack.c.bf16 %v1616_v2, %v1615_v1  ;;  %v1603_v1 = vld [vmem:[#allocation2 + $0x4b0] sm:$0xff] }
 0x3f8   :  { %3242 = vmatpush1.bf16.msra.mxu0 %v3241_v9  ;;  %v1632_v9 = vld [vmem:[#allocation2 + $0x598] sm:$0xff] }
 0x3f9   :  { %3244 = vmatprep.subr.bf16.mxu0 %v3243_v33  ;;  %v3253_v33 = vpack.c.bf16 %v1600_v53, %v1599_v17  ;;  %v3285_v24 = vpack.c.bf16 %v1632_v9, %v1631_v19  ;;  %v1654_v17 = vld [vmem:[#allocation2 + $0x648] sm:$0xff]  ;;  %v1605_v19 = vld [vmem:[#allocation2 + $0x4c0] sm:$0xff] }
 0x3fa   :  { %v1606_v9 = vld [vmem:[#allocation2 + $0x4c8] sm:$0xff] }
 0x3fc   :  { %3246 = vmatpush1.bf16.msra.mxu0 %v3245_v36  ;;  %v3255_v36 = vpack.c.bf16 %v1618_v22, %v1617_v41 }
 0x3fd   :  { %3280 = vmatprep.subr.bf16.mxu0 %v3279_v54  ;;  %v1620_v54 = vld [vmem:[#allocation2 + $0x538] sm:$0xff] }
 0x3fe   :  { %v3259_v2 = vpack.c.bf16 %v1620_v54, %v1619_v51  ;;  %v1626_v51 = vld [vmem:[#allocation2 + $0x568] sm:$0xff] }
 0x3ff   :  { %v1658_v54 = vld [vmem:[#allocation2 + $0x668] sm:$0xff] }
 0x4b2   :  { %v2775_v23 = vpop.f32.mrb[48].mxu0 }
 0x4b3   :  { %v1320_v32 = vpop.f32.mrb[49].mxu0  ;;  %v1326_v8 = vadd.f32 %v2775_v23, %v3802_v21  ;;  %v1604_v23 = vld [vmem:[#allocation2 + $0x4b8] sm:$0xff] }
 0x4b4   :  { %v1321_v12 = vadd.f32 %v3802_v21, %v1320_v32  ;;  %v1636_v32 = vld [vmem:[#allocation2 + $0x5b8] sm:$0xff] }
 0x4b6   :  { %1468 = vmatmul.mubr.f32.vlgmr.msra.gmra.mrb[32].mxu1 %v1321_v12  ;;  %1557 = vmatmul.mubr.f32.vlgmr.msra.gmra.mrb[52].mxu0 %v1321_v12  ;;  %v2778_v55 = vpop.f32.mrb[50].mxu0  ;;  %v1621_v12 = vld [vmem:[#allocation2 + $0x540] sm:$0xff] }
 0x4b7   :  { %1473 = vmatprep.mubr.f32.mxu1 %v3469_v39  ;;  %1562 = vmatprep.mubr.f32.mxu0 %v3469_v39  ;;  %v1330_v29 = vpop.f32.mrb[51].mxu0  ;;  %v1336_v53 = vadd.f32 %v2778_v55, %v3802_v21  ;;  %v3297_v55 = vpack.c.bf16 %v1638_v27, %v1637_v25  ;;  %v1881_v27 = vld [vmem:[#allocation2 + $0x380] sm:$0xff] }
 0x4b8   :  { %3250 = vmatpush3.bf16.msra.mxu1 %v3249_v49  ;;  %3282 = vmatpush3.bf16.msra.mxu0 %v3281_v14  ;;  %v1331_v52 = vadd.f32 %v3802_v21, %v1330_v29  ;;  %v1622_v49 = vld [vmem:[#allocation2 + $0x548] sm:$0xff]  ;;  %v1653_v14 = vld [vmem:[#allocation2 + $0x640] sm:$0xff]  ;;  %v1623_v29 = vld [vmem:[#allocation2 + $0x550] sm:$0xff]  ;;  %v3265_v21 = vpack.c.bf16 %v1606_v9, %v1605_v19 }
 0x4b9   :  { %3252 = vmatprep.subr.bf16.mxu1 %v3251_v18  ;;  %3284 = vmatprep.subr.bf16.mxu0 %v3283_v16  ;;  %v3261_v18 = vpack.c.bf16 %v1604_v23, %v1603_v1  ;;  %v3293_v16 = vpack.c.bf16 %v1636_v32, %v1635_v4  ;;  %v3263_v41 = vpack.c.bf16 %v1622_v49, %v1621_v12  ;;  %v1610_v23 = vld [vmem:[#allocation2 + $0x4e8] sm:$0xff]  ;;  %v1627_v12 = vld [vmem:[#allocation2 + $0x570] sm:$0xff]  ;;  %v1628_v49 = vld [vmem:[#allocation2 + $0x578] sm:$0xff] }
 0x4ba   :  { %1474 = vmatmul.mubr.f32.gmra.mrb[34].mxu1 %v1326_v8  ;;  %1563 = vmatmul.mubr.f32.gmra.mrb[54].mxu0 %v1326_v8  ;;  %v3295_v22 = vpack.c.bf16 %v1654_v17, %v1653_v14  ;;  %v1624_v8 = vld [vmem:[#allocation2 + $0x558] sm:$0xff]  ;;  %v1659_v14 = vld [vmem:[#allocation2 + $0x670] sm:$0xff]  ;;  %v3275_v17 = vpack.c.bf16 %v1628_v49, %v1627_v12 }
 0x4bb   :  { %1479 = vmatprep.mubr.f32.mxu1 %v3469_v39  ;;  %1568 = vmatprep.mubr.f32.mxu0 %v3469_v39  ;;  %v3267_v15 = vpack.c.bf16 %v1624_v8, %v1623_v29  ;;  %v1882_v29 = vld [vmem:[#allocation2 + $0x388] sm:$0xff]  ;;  %v1897_v8 = vld [vmem:[#allocation2 + $0x400] sm:$0xff] }
 0x4bc   :  { %3254 = vmatpush3.bf16.msra.mxu1 %v3253_v33  ;;  %3286 = vmatpush3.bf16.msra.mxu0 %v3285_v24  ;;  %v1655_v33 = vld [vmem:[#allocation2 + $0x650] sm:$0xff] }
 0x4bd   :  { %3256 = vmatprep.subr.bf16.mxu1 %v3255_v36  ;;  %3288 = vmatprep.subr.bf16.mxu0 %v3287_v40  ;;  %v1607_v24 = vld [vmem:[#allocation2 + $0x4d0] sm:$0xff] }
 0x4be   :  { %1480 = vmatmul.mubr.f32.gmra.mrb[36].mxu1 %v1331_v52  ;;  %1569 = vmatmul.mubr.f32.gmra.mrb[56].mxu0 %v1331_v52  ;;  %v1639_v40 = vld [vmem:[#allocation2 + $0x5d0] sm:$0xff]  ;;  %v1657_v52 = vld [vmem:[#allocation2 + $0x660] sm:$0xff]  ;;  %v3269_v56 = vpack.c.bf16 %v1608_v35, %v1607_v24  ;;  %v1866_v24 = vld [vmem:[#allocation2 + $0x308] sm:$0xff] }
 0x4bf   :  { %1485 = vmatprep.mubr.f32.mxu1 %v3469_v39  ;;  %1574 = vmatprep.mubr.f32.mxu0 %v3469_v39  ;;  %v1656_v39 = vld [vmem:[#allocation2 + $0x658] sm:$0xff]  ;;  %v3301_v57 = vpack.c.bf16 %v1640_v34, %v1639_v40  ;;  %v3303_v1 = vpack.c.bf16 %v1658_v54, %v1657_v52  ;;  %v1883_v35 = vld [vmem:[#allocation2 + $0x390] sm:$0xff] }
 0x4c0   :  { %3258 = vmatpush3.bf16.msra.mxu1 %v3257_v62  ;;  %3290 = vmatpush3.bf16.msra.mxu0 %v3289_v0  ;;  %v3299_v36 = vpack.c.bf16 %v1656_v39, %v1655_v33  ;;  %v1609_v62 = vld [vmem:[#allocation2 + $0x4e0] sm:$0xff]  ;;  %v3271_v0 = vpack.c.bf16 %v1626_v51, %v1625_v50  ;;  %v3311_v33 = vpack.c.bf16 %v1882_v29, %v1881_v27  ;;  %v1898_v39 = vld [vmem:[#allocation2 + $0x408] sm:$0xff]  ;;  %v1884_v40 = vld [vmem:[#allocation2 + $0x398] sm:$0xff] }
 0x4c1   :  { %3260 = vmatprep.subr.bf16.mxu1 %v3259_v2  ;;  %3292 = vmatprep.subr.bf16.mxu0 %v3291_v3  ;;  %v1641_v2 = vld [vmem:[#allocation2 + $0x5e0] sm:$0xff]  ;;  %v1642_v3 = vld [vmem:[#allocation2 + $0x5e8] sm:$0xff]  ;;  %v3273_v4 = vpack.c.bf16 %v1610_v23, %v1609_v62  ;;  %v1899_v34 = vld [vmem:[#allocation2 + $0x410] sm:$0xff] }
 0x4c2   :  { %1486 = vmatmul.mubr.f32.gmra.mrb[38].mxu1 %v1336_v53  ;;  %1575 = vmatmul.mubr.f32.gmra.mrb[58].mxu0 %v1336_v53  ;;  %v3305_v32 = vpack.c.bf16 %v1642_v3, %v1641_v2  ;;  %v1660_v53 = vld [vmem:[#allocation2 + $0x678] sm:$0xff]  ;;  %v1867_v2 = vld [vmem:[#allocation2 + $0x310] sm:$0xff]  ;;  %v1901_v29 = vld [vmem:[#allocation2 + $0x420] sm:$0xff] }
 0x4c3   :  { %v3307_v19 = vpack.c.bf16 %v1660_v53, %v1659_v14  ;;  %v1900_v50 = vld [vmem:[#allocation2 + $0x418] sm:$0xff] }
 0x4c4   :  { %3262 = vmatpush3.bf16.msra.mxu1 %v3261_v18  ;;  %3294 = vmatpush3.bf16.msra.mxu0 %v3293_v16  ;;  %v1611_v18 = vld [vmem:[#allocation2 + $0x4f0] sm:$0xff]  ;;  %v1612_v16 = vld [vmem:[#allocation2 + $0x4f8] sm:$0xff]  ;;  %v3347_v23 = vpack.c.bf16 %v1900_v50, %v1899_v34  ;;  %v1889_v50 = vld [vmem:[#allocation2 + $0x3c0] sm:$0xff] }
 0x4c5   :  { %3264 = vmatprep.subr.bf16.mxu1 %v3263_v41  ;;  %3296 = vmatprep.subr.bf16.mxu0 %v3295_v22  ;;  %v3277_v9 = vpack.c.bf16 %v1612_v16, %v1611_v18  ;;  %v1643_v41 = vld [vmem:[#allocation2 + $0x5f0] sm:$0xff]  ;;  %v1644_v22 = vld [vmem:[#allocation2 + $0x5f8] sm:$0xff] }
 0x4c6   :  { %v3309_v25 = vpack.c.bf16 %v1644_v22, %v1643_v41  ;;  %v1868_v3 = vld [vmem:[#allocation2 + $0x318] sm:$0xff] }
 0x4c8   :  { %3266 = vmatpush3.bf16.msra.mxu1 %v3265_v21  ;;  %3298 = vmatpush3.bf16.msra.mxu0 %v3297_v55  ;;  %v3343_v21 = vpack.c.bf16 %v1898_v39, %v1897_v8  ;;  %v1865_v55 = vld [vmem:[#allocation2 + $0x300] sm:$0xff] }
 0x4c9   :  { %3268 = vmatprep.subr.bf16.mxu1 %v3267_v15  ;;  %3300 = vmatprep.subr.bf16.mxu0 %v3299_v36  ;;  %v1869_v39 = vld [vmem:[#allocation2 + $0x320] sm:$0xff] }
 0x4cc   :  { %3270 = vmatpush3.bf16.msra.mxu1 %v3269_v56  ;;  %3302 = vmatpush3.bf16.msra.mxu0 %v3301_v57  ;;  %v3313_v57 = vpack.c.bf16 %v1866_v24, %v1865_v55  ;;  %v1870_v55 = vld [vmem:[#allocation2 + $0x328] sm:$0xff]  ;;  %v1888_v24 = vld [vmem:[#allocation2 + $0x3b8] sm:$0xff] }
 0x4cd   :  { %3272 = vmatprep.subr.bf16.mxu1 %v3271_v0  ;;  %3304 = vmatprep.subr.bf16.mxu0 %v3303_v1  ;;  %v3315_v1 = vpack.c.bf16 %v1884_v40, %v1883_v35  ;;  %v1904_v35 = vld [vmem:[#allocation2 + $0x438] sm:$0xff] }
 0x4d0   :  { %3274 = vmatpush3.bf16.msra.mxu1 %v3273_v4  ;;  %3306 = vmatpush3.bf16.msra.mxu0 %v3305_v32 }
 0x4d1   :  { %3276 = vmatprep.subr.bf16.mxu1 %v3275_v17  ;;  %3308 = vmatprep.subr.bf16.mxu0 %v3307_v19 }
 0x4d4   :  { %3278 = vmatpush3.bf16.msra.mxu1 %v3277_v9  ;;  %3310 = vmatpush3.bf16.msra.mxu0 %v3309_v25 }
 0x4d5   :  { %3312 = vmatprep.subr.bf16.mxu1 %v3311_v33  ;;  %3344 = vmatprep.subr.bf16.mxu0 %v3343_v21  ;;  %v1902_v33 = vld [vmem:[#allocation2 + $0x428] sm:$0xff] }
 0x589   :  { %v1469_v15 = vpop.f32.mrb[32].mxu1  ;;  %v1558_v36 = vpop.f32.mrb[52].mxu0 }
 0x58a   :  { %v1471_v51 = vpop.f32.mrb[33].mxu1  ;;  %v1560_v52 = vpop.f32.mrb[53].mxu0  ;;  %v1581_v62 = vmul.f32 %v1469_v15, %v3752_v31  ;;  %v1583_v0 = vmul.f32 %v1558_v36, %v3754_v61  ;;  %v3317_v31 = vpack.c.bf16 %v1868_v3, %v1867_v2  ;;  %v1871_v15 = vld [vmem:[#allocation2 + $0x330] sm:$0xff]  ;;  %v1872_v36 = vld [vmem:[#allocation2 + $0x338] sm:$0xff] }
 0x58b   :  { %v1582_v54 = vmul.f32 %v1471_v51, %v3748_v30  ;;  %v1584_v56 = vmul.f32 %v1560_v52, %v3750_v48  ;;  %v3325_v34 = vpack.c.bf16 %v1872_v36, %v1871_v15  ;;  %v1890_v51 = vld [vmem:[#allocation2 + $0x3c8] sm:$0xff]  ;;  %v1892_v2 = vld [vmem:[#allocation2 + $0x3d8] sm:$0xff] }
 0x58c   :  { %v3327_v52 = vpack.c.bf16 %v1890_v51, %v1889_v50 }
 0x58d   :  { %v1475_v4 = vpop.f32.mrb[34].mxu1  ;;  %v1564_v32 = vpop.f32.mrb[54].mxu0  ;;  %1729 = vmatprep.mubr.f32.mxu1 %v1582_v54  ;;  %1814 = vmatprep.mubr.f32.mxu0 %v1584_v56  ;;  %v1905_v54 = vld [vmem:[#allocation2 + $0x440] sm:$0xff]  ;;  %v1906_v56 = vld [vmem:[#allocation2 + $0x448] sm:$0xff] }
 0x58e   :  { %v1477_v12 = vpop.f32.mrb[35].mxu1  ;;  %v1566_v49 = vpop.f32.mrb[55].mxu0  ;;  %1730 = vmatmul.mubr.f32.vlgmr.msra.gmra.mrb[40].mxu1 %v1581_v62  ;;  %1815 = vmatmul.mubr.f32.vlgmr.msra.gmra.mrb[60].mxu0 %v1583_v0  ;;  %v1585_v61 = vmul.f32 %v1475_v4, %v3764_v44  ;;  %v1587_v14 = vmul.f32 %v1564_v32, %v3766_v45  ;;  %v3359_v62 = vpack.c.bf16 %v1906_v56, %v1905_v54  ;;  %v1874_v0 = vld [vmem:[#allocation2 + $0x348] sm:$0xff]  ;;  %v1907_v4 = vld [vmem:[#allocation2 + $0x450] sm:$0xff]  ;;  %v1908_v32 = vld [vmem:[#allocation2 + $0x458] sm:$0xff] }
 0x58f   :  { %v1586_v30 = vmul.f32 %v1477_v12, %v3760_v42  ;;  %v1588_v48 = vmul.f32 %v1566_v49, %v3762_v43  ;;  %3314 = vmatpush3.bf16.msra.mxu1 %v3313_v57  ;;  %3346 = vmatpush3.bf16.msra.mxu0 %v3343_v21  ;;  %v3351_v21 = vpack.c.bf16 %v1902_v33, %v1901_v29  ;;  %v1873_v57 = vld [vmem:[#allocation2 + $0x340] sm:$0xff]  ;;  %v1875_v12 = vld [vmem:[#allocation2 + $0x350] sm:$0xff] }
 0x590   :  { %3316 = vmatprep.subr.bf16.mxu1 %v3315_v1  ;;  %3348 = vmatprep.subr.bf16.mxu0 %v3347_v23  ;;  %v3329_v1 = vpack.c.bf16 %v1874_v0, %v1873_v57  ;;  %v3363_v49 = vpack.c.bf16 %v1908_v32, %v1907_v4  ;;  %v1661_v33 = vld [vmem:[#allocation2 + $0x920] sm:$0xff]  ;;  %v1663_v0 = vld [vmem:[#allocation2 + $0x930] sm:$0xff] }
 0x591   :  { %v1481_v17 = vpop.f32.mrb[36].mxu1  ;;  %v1570_v53 = vpop.f32.mrb[56].mxu0  ;;  %1734 = vmatprep.mubr.f32.mxu1 %v1586_v30  ;;  %1819 = vmatprep.mubr.f32.mxu0 %v1588_v48  ;;  %v1876_v30 = vld [vmem:[#allocation2 + $0x358] sm:$0xff] }
 0x592   :  { %v1483_v18 = vpop.f32.mrb[37].mxu1  ;;  %v1572_v16 = vpop.f32.mrb[57].mxu0  ;;  %1735 = vmatmul.mubr.f32.gmra.mrb[42].mxu1 %v1585_v61  ;;  %1820 = vmatmul.mubr.f32.gmra.mrb[62].mxu0 %v1587_v14  ;;  %v1589_v44 = vmul.f32 %v1481_v17, %v3776_v60  ;;  %v1591_v45 = vmul.f32 %v1570_v53, %v3778_v63  ;;  %v1885_v60 = vld [vmem:[#allocation2 + $0x3a0] sm:$0xff]  ;;  %v1886_v63 = vld [vmem:[#allocation2 + $0x3a8] sm:$0xff]  ;;  %v3333_v48 = vpack.c.bf16 %v1876_v30, %v1875_v12 }
 0x593   :  { %v1590_v42 = vmul.f32 %v1483_v18, %v3772_v58  ;;  %v1592_v43 = vmul.f32 %v1572_v16, %v3774_v59  ;;  %3318 = vmatpush3.bf16.msra.mxu1 %v3317_v31  ;;  %3350 = vmatpush3.bf16.msra.mxu0 %v3347_v23  ;;  %v3319_v8 = vpack.c.bf16 %v1886_v63, %v1885_v60  ;;  %v1891_v23 = vld [vmem:[#allocation2 + $0x3d0] sm:$0xff]  ;;  %v1893_v31 = vld [vmem:[#allocation2 + $0x3e0] sm:$0xff]  ;;  %v1894_v61 = vld [vmem:[#allocation2 + $0x3e8] sm:$0xff] }
 0x594   :  { %3352 = vmatprep.subr.bf16.mxu0 %v3351_v21  ;;  %v3331_v3 = vpack.c.bf16 %v1892_v2, %v1891_v23  ;;  %v3335_v14 = vpack.c.bf16 %v1894_v61, %v1893_v31  ;;  %v1909_v17 = vld [vmem:[#allocation2 + $0x460] sm:$0xff]  ;;  %v1910_v53 = vld [vmem:[#allocation2 + $0x468] sm:$0xff]  ;;  %v1837_v2 = vld [vmem:[#allocation2 + $0x950] sm:$0xff] }
 0x595   :  { %v1487_v19 = vpop.f32.mrb[38].mxu1  ;;  %v1576_v9 = vpop.f32.mrb[58].mxu0  ;;  %1739 = vmatprep.mubr.f32.mxu1 %v1590_v42  ;;  %1824 = vmatprep.mubr.f32.mxu0 %v1592_v43  ;;  %v1877_v18 = vld [vmem:[#allocation2 + $0x360] sm:$0xff]  ;;  %v3367_v16 = vpack.c.bf16 %v1910_v53, %v1909_v17  ;;  %v1878_v42 = vld [vmem:[#allocation2 + $0x368] sm:$0xff]  ;;  %v1841_v31 = vmul.f32 %v1837_v2, %v3738_v28  ;;  %v1664_v61 = vld [vmem:[#allocation2 + $0x938] sm:$0xff] }
 0x596   :  { %v1489_v41 = vpop.f32.mrb[39].mxu1  ;;  %v1578_v22 = vpop.f32.mrb[59].mxu0  ;;  %1740 = vmatmul.mubr.f32.gmra.mrb[44].mxu1 %v1589_v44  ;;  %1825 = vmatmul.mubr.f32.gmra.mrb[64].mxu0 %v1591_v45  ;;  %v1593_v59 = vmul.f32 %v1487_v19, %v3788_v11  ;;  %v1595_v27 = vmul.f32 %v1576_v9, %v3790_v13  ;;  %v1903_v11 = vld [vmem:[#allocation2 + $0x430] sm:$0xff]  ;;  %v3337_v43 = vpack.c.bf16 %v1878_v42, %v1877_v18  ;;  %v1896_v45 = vld [vmem:[#allocation2 + $0x3f8] sm:$0xff]  ;;  %v2097_v60 = vld [vmem:[#allocation2 + $0x888] sm:$0xff] }
 0x597   :  { %v1594_v25 = vmul.f32 %v1489_v41, %v3784_v5  ;;  %v1596_v58 = vmul.f32 %v1578_v22, %v3786_v6  ;;  %3320 = vmatprep.subr.bf16.mxu1 %v3319_v8  ;;  %v3321_v5 = vpack.c.bf16 %v1870_v55, %v1869_v39  ;;  %v1887_v6 = vld [vmem:[#allocation2 + $0x3b0] sm:$0xff]  ;;  %3354 = vmatpush3.bf16.msra.mxu0 %v3351_v21  ;;  %v1912_v41 = vld [vmem:[#allocation2 + $0x478] sm:$0xff] }
 0x598   :  { %v3323_v13 = vpack.c.bf16 %v1888_v24, %v1887_v6  ;;  %v3355_v40 = vpack.c.bf16 %v1904_v35, %v1903_v11  ;;  %v1895_v44 = vld [vmem:[#allocation2 + $0x3f0] sm:$0xff]  ;;  %v1835_v6 = vld [vmem:[#allocation2 + $0x940] sm:$0xff]  ;;  %v1662_v35 = vld [vmem:[#allocation2 + $0x928] sm:$0xff] }
 0x599   :  { %1744 = vmatprep.mubr.f32.mxu1 %v1594_v25  ;;  %1829 = vmatprep.mubr.f32.mxu0 %v1596_v58  ;;  %v1911_v19 = vld [vmem:[#allocation2 + $0x470] sm:$0xff]  ;;  %v3339_v9 = vpack.c.bf16 %v1896_v45, %v1895_v44  ;;  %v1880_v25 = vld [vmem:[#allocation2 + $0x378] sm:$0xff] }
 0x59a   :  { %1745 = vmatmul.mubr.f32.gmra.mrb[46].mxu1 %v1593_v59  ;;  %1830 = vmatmul.mubr.f32.gmra.mrb[66].mxu0 %v1595_v27  ;;  %v1879_v22 = vld [vmem:[#allocation2 + $0x370] sm:$0xff]  ;;  %v3371_v58 = vpack.c.bf16 %v1912_v41, %v1911_v19  ;;  %v2096_v27 = vld [vmem:[#allocation2 + $0x880] sm:$0xff] }
 0x59b   :  { %3322 = vmatpush3.bf16.msra.mxu1 %v3321_v5  ;;  %3356 = vmatprep.subr.bf16.mxu0 %v3355_v40  ;;  %v3341_v59 = vpack.c.bf16 %v1880_v25, %v1879_v22  ;;  %v3830_v63 = vpack.c.bf16 %v2097_v60, %v2096_v27 }
 0x59c   :  { %3324 = vmatprep.subr.bf16.mxu1 %v3323_v13  ;;  %3358 = vmatpush3.bf16.msra.mxu0 %v3355_v40  ;;  %v1839_v40 = vmul.f32 %v1835_v6, %v3727_v46 }
 0x59d   :  { %3360 = vmatprep.subr.bf16.mxu0 %v3359_v62 }
 0x59f   :  { %3326 = vmatpush3.bf16.msra.mxu1 %v3325_v34 }
 0x5a0   :  { %3328 = vmatprep.subr.bf16.mxu1 %v3327_v52  ;;  %3362 = vmatpush3.bf16.msra.mxu0 %v3359_v62  ;;  %v1836_v52 = vld [vmem:[#allocation2 + $0x948] sm:$0xff] }
 0x5a1   :  { %3364 = vmatprep.subr.bf16.mxu0 %v3363_v49  ;;  %v1840_v4 = vmul.f32 %v1836_v52, %v3732_v7  ;;  %v2107_v52 = vld [vmem:[#allocation2 + $0x8d8] sm:$0xff] }
 0x5a3   :  { %3330 = vmatpush3.bf16.msra.mxu1 %v3329_v1 }
 0x5a4   :  { %3332 = vmatprep.subr.bf16.mxu1 %v3331_v3  ;;  %3366 = vmatpush3.bf16.msra.mxu0 %v3363_v49 }
 0x5a5   :  { %3368 = vmatprep.subr.bf16.mxu0 %v3367_v16 }
 0x5a7   :  { %3334 = vmatpush3.bf16.msra.mxu1 %v3333_v48 }
 0x5a8   :  { %3336 = vmatprep.subr.bf16.mxu1 %v3335_v14  ;;  %3370 = vmatpush3.bf16.msra.mxu0 %v3367_v16 }
 0x5a9   :  { %3372 = vmatprep.subr.bf16.mxu0 %v3371_v58 }
 0x5ab   :  { %3338 = vmatpush3.bf16.msra.mxu1 %v3337_v43  ;;  %v1838_v43 = vld [vmem:[#allocation2 + $0x958] sm:$0xff] }
 0x5ac   :  { %3340 = vmatprep.subr.bf16.mxu1 %v3339_v9  ;;  %3374 = vmatpush3.bf16.msra.mxu0 %v3371_v58  ;;  %v1842_v25 = vmul.f32 %v1838_v43, %v3744_v37 }
 0x5af   :  { %3342 = vmatpush3.bf16.msra.mxu1 %v3341_v59 }
 0x5b0   :  { %3376 = vmatprep.subr.bf16.mxu1 %v3830_v63 }
 0x661   :  { %v2537_v29 = vpop.f32.mrb[40].mxu1  ;;  %v2581_v8 = vpop.f32.mrb[60].mxu0 }
 0x662   :  { %v2538_v39 = vpop.f32.mrb[41].mxu1  ;;  %v2582_v21 = vpop.f32.mrb[61].mxu0 }
 0x663   :  { %v2539_v55 = vadd.f32 %v2538_v39, %v2537_v29  ;;  %v2583_v5 = vadd.f32 %v2582_v21, %v2581_v8  ;;  %v2098_v39 = vld [vmem:[#allocation2 + $0x890] sm:$0xff]  ;;  %v2099_v21 = vld [vmem:[#allocation2 + $0x898] sm:$0xff] }
 0x665   :  { %v1732_v24 = vadd.f32 %v2539_v55, %v1661_v33  ;;  %v2540_v11 = vpop.f32.mrb[42].mxu1  ;;  %v2584_v13 = vpop.f32.mrb[62].mxu0 }
 0x666   :  { %v2541_v15 = vpop.f32.mrb[43].mxu1  ;;  %v2585_v36 = vpop.f32.mrb[63].mxu0 }
 0x667   :  { %v1817_v34 = vadd.f32 %v2583_v5, %v1732_v24  ;;  %v2542_v50 = vadd.f32 %v2541_v15, %v2540_v11  ;;  %v2586_v51 = vadd.f32 %v2585_v36, %v2584_v13  ;;  %v3379_v24 = vpack.c.bf16 %v2099_v21, %v2098_v39  ;;  %v2100_v11 = vld [vmem:[#allocation2 + $0x8a0] sm:$0xff]  ;;  %v2101_v13 = vld [vmem:[#allocation2 + $0x8a8] sm:$0xff]  ;;  %v2102_v15 = vld [vmem:[#allocation2 + $0x8b0] sm:$0xff] }
 0x668   :  { %v2103_v36 = vld [vmem:[#allocation2 + $0x8b8] sm:$0xff] }
 0x669   :  { %v1843_v54 = vadd.f32 %v1839_v40, %v1817_v34  ;;  %v1737_v56 = vadd.f32 %v2542_v50, %v1662_v35  ;;  %v2543_v57 = vpop.f32.mrb[44].mxu1  ;;  %v2587_v62 = vpop.f32.mrb[64].mxu0  ;;  %v3383_v35 = vpack.c.bf16 %v2101_v13, %v2100_v11  ;;  %v3387_v40 = vpack.c.bf16 %v2103_v36, %v2102_v15  ;;  %v2104_v34 = vld [vmem:[#allocation2 + $0x8c0] sm:$0xff]  ;;  %v2105_v50 = vld [vmem:[#allocation2 + $0x8c8] sm:$0xff] }
 0x66a   :  { %v2544_v1 = vpop.f32.mrb[45].mxu1  ;;  %v2588_v23 = vpop.f32.mrb[65].mxu0 }
 0x66b   :  { %v1822_v3 = vadd.f32 %v2586_v51, %v1737_v56  ;;  %v2545_v32 = vadd.f32 %v2544_v1, %v2543_v57  ;;  %v2589_v12 = vadd.f32 %v2588_v23, %v2587_v62  ;;  %v1856_v53 = vrot.slane %v1843_v54, 6  ;;  %v2108_v56 = vld [vmem:[#allocation2 + $0x8e0] sm:$0xff]  ;;  %v2109_v57 = vld [vmem:[#allocation2 + $0x8e8] sm:$0xff]  ;;  %v2111_v1 = vld [vmem:[#allocation2 + $0x8f8] sm:$0xff] }
 0x66c   :  { %v1847_v44 = vrot.slane %v1843_v54, 7  ;;  %v3391_v51 = vpack.c.bf16 %v2105_v50, %v2104_v34  ;;  %v3399_v62 = vpack.c.bf16 %v2109_v57, %v2108_v56 }
 0x66d   :  { %v1844_v49 = vadd.f32 %v1840_v4, %v1822_v3  ;;  %v1742_v30 = vadd.f32 %v2545_v32, %v1663_v0  ;;  %v2546_v46 = vpop.f32.mrb[46].mxu1  ;;  %v2590_v48 = vpop.f32.mrb[66].mxu0  ;;  %v2110_v0 = vld [vmem:[#allocation2 + $0x8f0] sm:$0xff]  ;;  %v2247_v32 = vld [vmem:[#allocation2 + $0x982] ss:$0 sm:$0xff] }
 0x66e   :  { %v2547_v14 = vpop.f32.mrb[47].mxu1  ;;  %v2591_v17 = vpop.f32.mrb[67].mxu0  ;;  %v3403_v23 = vpack.c.bf16 %v2111_v1, %v2110_v0 }
 0x66f   :  { %v1857_v18 = vrot.slane %v1844_v49, 6  ;;  %v1827_v16 = vadd.f32 %v2589_v12, %v1742_v30  ;;  %v2548_v42 = vadd.f32 %v2547_v14, %v2546_v46  ;;  %v2592_v7 = vadd.f32 %v2591_v17, %v2590_v48 }
 0x670   :  { %v1848_v45 = vrot.slane %v1844_v49, 7 }
 0x671   :  { %v1845_v19 = vadd.f32 %v1841_v31, %v1827_v16  ;;  %v1747_v9 = vadd.f32 %v2548_v42, %v1664_v61  ;;  %v1863_v28 = vsel %vm1860_vm4, %v1856_v53, %v1857_v18 }
 0x672   :  { %v1854_v41 = vsel %vm1851_vm3, %v1847_v44, %v1848_v45 }
 0x673   :  { %v1832_v22 = vadd.f32 %v2592_v7, %v1747_v9  ;;  %v1858_v58 = vrot.slane %v1845_v19, 6  ;;  %v1849_v59 = vrot.slane %v1845_v19, 7 }
 0x675   :  { %v1846_v27 = vadd.f32 %v1842_v25, %v1832_v22  ;;  %v1862_v60 = vsel %vm1860_vm4, %v1857_v18, %v1858_v58  ;;  %v1853_v29 = vsel %vm1851_vm3, %v1848_v45, %v1849_v59 }
 0x677   :  { %v1850_v8 = vrot.slane %v1846_v27, 7  ;;  %v1859_v33 = vrot.slane %v1846_v27, 6 }
 0x679   :  { %v1855_v55 = vsel %vm1851_vm3, %v1850_v8, %v1847_v44  ;;  %v1864_v5 = vsel %vm1860_vm4, %v1859_v33, %v1856_v53  ;;  %v1861_v37 = vsel %vm1860_vm4, %v1858_v58, %v1859_v33  ;;  %v1852_v6 = vsel %vm1851_vm3, %v1849_v59, %v1850_v8  ;;  %v2248_v8 = vld [vmem:[#allocation2 + $0x983] ss:$0 sm:$0xff] }
 0x67a   :  { %1982 = vmatprep.mubr.f32.mxu1 %v1855_v55  ;;  %2811 = vmatprep.mubr.f32.mxu0 %v1864_v5  ;;  %v2207_v55 = vld [vmem:[#allocation2 + $0x968] sm:$0xff] }
 0x67b   :  { %1983 = vmatmul.mubr.f32.vlgmr.msra.gmra.mrb[48].mxu1 %v1843_v54  ;;  %2812 = vmatmul.mubr.f32.vlgmr.msra.gmra.mrb[68].mxu0 %v1863_v28 }
 0x67c   :  { %1987 = vmatprep.mubr.f32.mxu1 %v1854_v41  ;;  %2814 = vmatprep.mubr.f32.mxu0 %v1862_v60 }
 0x67d   :  { %3378 = vmatpush3.bf16.msra.mxu1 %v3830_v63  ;;  %v2106_v63 = vld [vmem:[#allocation2 + $0x8d0] sm:$0xff] }
 0x67e   :  { %3380 = vmatprep.subr.bf16.mxu1 %v3379_v24  ;;  %v3395_v54 = vpack.c.bf16 %v2107_v52, %v2106_v63 }
 0x67f   :  { %1988 = vmatmul.mubr.f32.gmra.mrb[50].mxu1 %v1844_v49  ;;  %2815 = vmatmul.mubr.f32.gmra.mrb[70].mxu0 %v1861_v37  ;;  %v2206_v37 = vld [vmem:[#allocation2 + $0x960] sm:$0xff] }
 0x680   :  { %1992 = vmatprep.mubr.f32.mxu1 %v1853_v29 }
 0x681   :  { %3382 = vmatpush3.bf16.msra.mxu1 %v3379_v24 }
 0x682   :  { %3384 = vmatprep.subr.bf16.mxu1 %v3383_v35 }
 0x683   :  { %1993 = vmatmul.mubr.f32.gmra.mrb[52].mxu1 %v1845_v19 }
 0x684   :  { %1997 = vmatprep.mubr.f32.mxu1 %v1852_v6 }
 0x685   :  { %3386 = vmatpush3.bf16.msra.mxu1 %v3383_v35 }
 0x686   :  { %3388 = vmatprep.subr.bf16.mxu1 %v3387_v40 }
 0x687   :  { %1998 = vmatmul.mubr.f32.gmra.mrb[54].mxu1 %v1846_v27 }
 0x689   :  { %3390 = vmatpush3.bf16.msra.mxu1 %v3387_v40  ;;  %v2209_v40 = vld [vmem:[#allocation2 + $0x978] sm:$0xff] }
 0x68a   :  { %3392 = vmatprep.subr.bf16.mxu1 %v3391_v51 }
 0x68d   :  { %3394 = vmatpush3.bf16.msra.mxu1 %v3391_v51  ;;  %v2208_v51 = vld [vmem:[#allocation2 + $0x970] sm:$0xff] }
 0x68e   :  { %3396 = vmatprep.subr.bf16.mxu1 %v3395_v54 }
 0x691   :  { %3398 = vmatpush3.bf16.msra.mxu1 %v3395_v54 }
 0x692   :  { %3400 = vmatprep.subr.bf16.mxu1 %v3399_v62 }
 0x695   :  { %3402 = vmatpush3.bf16.msra.mxu1 %v3399_v62 }
 0x696   :  { %3404 = vmatprep.subr.bf16.mxu1 %v3403_v23 }
 0x699   :  { %3406 = vmatpush3.bf16.msra.mxu1 %v3403_v23 }
 0x74e   :  { %v2625_v2 = vpop.f32.mrb[48].mxu1  ;;  %v2813_v3 = vpop.f32.mrb[68].mxu0 }
 0x74f   :  { %v2626_v4 = vpop.f32.mrb[49].mxu1  ;;  %v2069_v12 = vpop.f32.mrb[69].mxu0 }
 0x750   :  { %v2627_v49 = vadd.f32 %v2626_v4, %v2625_v2 }
 0x752   :  { %v1985_v30 = vadd.f32 %v2627_v49, %v2247_v32  ;;  %v2628_v46 = vpop.f32.mrb[50].mxu1  ;;  %v2816_v48 = vpop.f32.mrb[70].mxu0 }
 0x753   :  { %v2629_v31 = vpop.f32.mrb[51].mxu1  ;;  %v2079_v61 = vpop.f32.mrb[71].mxu0 }
 0x754   :  { %v2070_v14 = vadd.f32 %v2069_v12, %v1985_v30  ;;  %v2630_v17 = vadd.f32 %v2629_v31, %v2628_v46 }
 0x756   :  { %v2088_v53 = vmax.f32 %v2070_v14, 0.0  ;;  %v1990_v18 = vadd.f32 %v2630_v17, %v2247_v32  ;;  %v2631_v16 = vpop.f32.mrb[52].mxu1 }
 0x757   :  { %v2632_v42 = vpop.f32.mrb[53].mxu1 }
 0x758   :  { %v2092_v7 = vadd.f32 %v2088_v53, %v3630_v20  ;;  %v2075_v43 = vadd.f32 %v2813_v3, %v1990_v18  ;;  %v2633_v44 = vadd.f32 %v2632_v42, %v2631_v16 }
 0x75a   :  { %v2089_v45 = vmax.f32 %v2075_v43, 0.0  ;;  %v1995_v19 = vadd.f32 %v2633_v44, %v2247_v32  ;;  %v2634_v9 = vpop.f32.mrb[54].mxu1  ;;  %2849 = vmatprep.mubr.f32.mxu1 %v2092_v7 }
 0x75b   :  { %v2635_v28 = vpop.f32.mrb[55].mxu1 }
 0x75c   :  { %v2093_v41 = vadd.f32 %v2089_v45, %v3636_v26  ;;  %v2080_v22 = vadd.f32 %v2079_v61, %v1995_v19  ;;  %v2636_v25 = vadd.f32 %v2635_v28, %v2634_v9 }
 0x75e   :  { %v2090_v58 = vmax.f32 %v2080_v22, 0.0  ;;  %v2000_v59 = vadd.f32 %v2636_v25, %v2247_v32  ;;  %2850 = vmatmul.mubr.f32.vlgmr.msra.gmra.mrb[56].mxu1 %v2093_v41 }
 0x760   :  { %v2085_v27 = vadd.f32 %v2816_v48, %v2000_v59  ;;  %v2094_v60 = vadd.f32 %v2090_v58, %v3647_v47 }
 0x762   :  { %v2091_v29 = vmax.f32 %v2085_v27, 0.0  ;;  %2852 = vmatprep.mubr.f32.mxu1 %v2094_v60 }
 0x764   :  { %v2095_v20 = vadd.f32 %v2091_v29, %v3661_v10 }
 0x766   :  { %2853 = vmatmul.mubr.f32.gmra.mrb[58].mxu1 %v2095_v20 }
 0x831   :  { %v2851_v33 = vpop.f32.mrb[56].mxu1 }
 0x832   :  { %v2189_v39 = vadd.f32 %v2851_v33, %v2248_v8  ;;  %v2183_v21 = vpop.f32.mrb[57].mxu1 }
 0x833   :  { %v2184_v5 = vadd.f32 %v2248_v8, %v2183_v21 }
 0x834   :  { %v2203_v26 = vmax.f32 %v2189_v39, 0.0 }
 0x835   :  { %v2202_v6 = vmax.f32 %v2184_v5, 0.0 }
 0x836   :  { %v2211_v24 = vmul.f32 %v2207_v55, %v2203_v26 }
 0x837   :  { %v2210_v11 = vmul.f32 %v2206_v37, %v2202_v6 }
 0x838   :  { %v2215_v13 = vrot.slane %v2211_v24, 7 }
 0x839   :  { %v2214_v35 = vrot.slane %v2210_v11, 7  ;;  %v2854_v15 = vpop.f32.mrb[58].mxu1 }
 0x83a   :  { %v2199_v47 = vadd.f32 %v2854_v15, %v2248_v8  ;;  %v2193_v36 = vpop.f32.mrb[59].mxu1 }
 0x83b   :  { %v2194_v34 = vadd.f32 %v2248_v8, %v2193_v36  ;;  %v2220_v10 = vsel %vm1851_vm3, %v2214_v35, %v2215_v13 }
 0x83c   :  { %v2205_v50 = vmax.f32 %v2199_v47, 0.0 }
 0x83d   :  { %v2204_v63 = vmax.f32 %v2194_v34, 0.0 }
 0x83e   :  { %v2213_v52 = vmul.f32 %v2209_v40, %v2205_v50 }
 0x83f   :  { %v2212_v54 = vmul.f32 %v2208_v51, %v2204_v63 }
 0x840   :  { %v2217_v56 = vrot.slane %v2213_v52, 7 }
 0x841   :  { %v2216_v57 = vrot.slane %v2212_v54, 7 }
 0x842   :  { %v2221_v62 = vsel %vm1851_vm3, %v2217_v56, %v2214_v35 }
 0x843   :  { %2222 = vrot.lane.b32.xlu0 %v2221_v62, %s3470_s0  ;;  %v2219_v0 = vsel %vm1851_vm3, %v2215_v13, %v2216_v57  ;;  %v2218_v1 = vsel %vm1851_vm3, %v2216_v57, %v2217_v56 }
 0x844   :  { %2226 = vrot.lane.b32.xlu1 %v2219_v0, %s3470_s0 }
 0x847   :  { %2224 = vrot.lane.b32.xlu0 %v2220_v10, %s3470_s0 }
 0x848   :  { %2228 = vrot.lane.b32.xlu1 %v2218_v1, %s3470_s0 }
 0x8b5   :  { %v2223_v23 = vpop.permute.xlu0 %2222 }
 0x8b6   :  { %2230 = vst [vmem:[%s3883_s3] sm:$0xff] %v2223_v23  ;;  %v2227_v2 = vpop.permute.xlu1 %2226 }
 0x8b7   :  { %2232 = vst [vmem:[%s3883_s3 + $0x10] sm:$0xff] %v2227_v2 }
 0x8b9   :  { %v2225_v3 = vpop.permute.xlu0 %2224 }
 0x8ba   :  { %2231 = vst [vmem:[%s3883_s3 + $0x8] sm:$0xff] %v2225_v3  ;;  %v2229_v38 = vpop.permute.xlu1 %2228 }
 0x8bb   :  { %2233 = vst [vmem:[%s3883_s3 + $0x18] sm:$0xff] %v2229_v38 }
 0x8bc   :  { %2238 = vsyncpa [#allocation3], 1 }
 0x8bd   :  { %2239 = vsyncpa [#allocation5], 1 }

</bundles_post_ra>
